<compile_context>
chip_gen: v7x
topology: tpu7x:2x2x1
jax: 0.10.0
libtpu: 0.0.40
codegen_flags: <defaults>
</compile_context>

<pallas_src>
import functools

import jax
import jax.numpy as jnp
from jax.experimental import pallas as pl
from jax.experimental.pallas import tpu as pltpu


def _stable_sigmoid(z):
    # Numerically-stable sigmoid: one exp + one approx reciprocal (both EUP).
    e = jnp.exp(-jnp.abs(z))
    inv = pl.reciprocal(1.0 + e, approx=True)
    return jnp.where(z >= 0, inv, e * inv)


def _channel_mix(w, z):
    """(O, K) x (K, HW) -> (O, HW) with f32 accumulation.

    For tiny K (< 8) the MXU tile would be nearly all padding, so do K
    broadcasted VPU multiply-adds instead; otherwise use a bf16 MXU dot.
    """
    K = z.shape[0]
    if K < 8:
        acc = w[:, 0:1] * z[0:1, :]
        for i in range(1, K):
            acc = acc + w[:, i:i + 1] * z[i:i + 1, :]
        return acc
    return jnp.dot(w.astype(jnp.bfloat16), z.astype(jnp.bfloat16),
                   preferred_element_type=jnp.float32)


def _dilated_conv3x3(z, w9, b, masks, row_shifts, col_shifts):
    """3x3 conv, dilation=d, padding=d (same spatial size), Cr -> Cr.

    z:     (Cr, HW) f32   flat spatial lanes of one image
    w9:    (9, Cr, Cr) f32  tap-major weights [ki*3+kj, out, in]
    b:     (Cr, 1) f32
    masks: (9, HW) f32    border-validity mask per tap
    """
    # Three row-shifted copies (2 large XLU rolls) reused by all column taps.
    rows = []
    for ki in range(3):
        s = row_shifts[ki]
        rows.append(z if s == 0 else pltpu.roll(z, shift=s, axis=1))

    # Init accumulator from the center tap (no roll, mask is all-ones) + bias.
    acc = _channel_mix(w9[4], z) + b
    for ki in range(3):
        for kj in range(3):
            k = ki * 3 + kj
            if k == 4:
                continue
            cs = col_shifts[kj]
            tap = rows[ki] if cs == 0 else pltpu.roll(rows[ki], shift=cs, axis=1)
            acc = acc + _channel_mix(w9[k], tap * masks[k:k + 1, :])
    return acc


def _bam_kernel(row_shifts, col_shifts,
                x_ref, mask_ref,
                fc1w_ref, fc1b_ref, fc2w_ref, fc2b_ref,
                c1w_ref, c1b_ref,
                w2_ref, b2_ref, w3_ref, b3_ref,
                w4_ref, c4_ref,
                out_ref):
    """One grid step == one batch element in channel-major (C, HW) layout."""
    C, HW = x_ref.shape
    xb = x_ref[...]                                    # (C, HW) bf16
    masks = mask_ref[...]                              # (9, HW) f32

    # ---------------- channel attention branch ------------------------------
    # AdaptiveAvgPool2d(1) as an MXU dot against a ones/HW vector (f32 accum).
    ones_hw = jnp.ones((HW, 1), jnp.bfloat16)
    pooled = jnp.dot(xb, ones_hw,
                     preferred_element_type=jnp.float32) * (1.0 / HW)   # (C, 1)
    h = jnp.maximum(
        jnp.dot(fc1w_ref[...], pooled, preferred_element_type=jnp.float32)
        + fc1b_ref[...], 0.0)                                           # (Cr, 1)
    y1 = _stable_sigmoid(
        jnp.dot(fc2w_ref[...], h, preferred_element_type=jnp.float32)
        + fc2b_ref[...])                                                # (C, 1)

    # ---------------- spatial attention branch ------------------------------
    # conv1 (1x1, C -> Cr): bf16 MXU dot with wide lane dim, f32 accumulation.
    t = jnp.dot(c1w_ref[...], xb,
                preferred_element_type=jnp.float32) + c1b_ref[...]      # (Cr, HW)
    u = _dilated_conv3x3(t, w2_ref[...], b2_ref[...], masks,
                         row_shifts, col_shifts)                        # conv2
    v = _dilated_conv3x3(u, w3_ref[...], b3_ref[...], masks,
                         row_shifts, col_shifts)                        # conv3
    # conv4 (1x1, Cr -> 1) with eval-mode BatchNorm folded into (w4, c4).
    s = _channel_mix(w4_ref[...], v) + c4_ref[...]                      # (1, HW)

    # ---------------- combine: sigmoid(channel + spatial) -------------------
    # y1 broadcasts over space, s broadcasts over channels; single lane-dense
    # (C, HW) store.
    out_ref[...] = _stable_sigmoid(y1 + s).astype(out_ref.dtype)


def bam_forward(x, params, reduction=16, dilation=4):
    B, C, H, W = x.shape
    Cr = C // reduction
    HW = H * W
    f32 = jnp.float32
    bf16 = jnp.bfloat16
    eps = 1e-5

    # (B, C, H, W) -> (B, C, HW) is a free reshape (no transpose).  bf16 halves
    # the kernel's HBM read and the VMEM double-buffer of the dominant x block
    # (all dots keep f32 accumulation).
    x3 = x.reshape(B, C, HW).astype(bf16)

    # Border-validity masks (9, HW) and static flat-lane roll shifts.
    yy, xx = jnp.meshgrid(jnp.arange(H), jnp.arange(W), indexing="ij")
    mask_rows = []
    for ki in range(3):
        for kj in range(3):
            dy, dx = (ki - 1) * dilation, (kj - 1) * dilation
            valid = ((yy + dy >= 0) & (yy + dy < H) &
                     (xx + dx >= 0) & (xx + dx < W))
            mask_rows.append(valid.reshape(-1).astype(f32))
    mask_arr = jnp.stack(mask_rows, axis=0)                       # (9, HW)
    row_shifts = tuple(int((-(ki - 1) * dilation * W) % HW) for ki in range(3))
    col_shifts = tuple(int((-(kj - 1) * dilation) % HW) for kj in range(3))

    fc1_w = params["fc1_w"].astype(f32)                           # (Cr, C)
    fc1_b = params["fc1_b"].reshape(Cr, 1).astype(f32)
    fc2_w = params["fc2_w"].astype(f32)                           # (C, Cr)
    fc2_b = params["fc2_b"].reshape(C, 1).astype(f32)
    c1_w = params["conv1_w"].astype(bf16)                         # (Cr, C) bf16
    c1_b = params["conv1_b"].reshape(Cr, 1).astype(f32)
    # 3x3 weights as (9, Cr_out, Cr_in): index [ki*3+kj, o, i].
    w2m = params["conv2_w"].transpose(2, 3, 0, 1).reshape(9, Cr, Cr).astype(f32)
    w3m = params["conv3_w"].transpose(2, 3, 0, 1).reshape(9, Cr, Cr).astype(f32)
    b2 = params["conv2_b"].reshape(Cr, 1).astype(f32)
    b3 = params["conv3_b"].reshape(Cr, 1).astype(f32)
    bn_scale = params["bn_gamma"] / jnp.sqrt(params["bn_var"] + eps)
    bn_shift = params["bn_beta"] - params["bn_mean"] * bn_scale
    w4_eff = (params["conv4_w"] * bn_scale[0]).reshape(1, Cr).astype(f32)
    c4_eff = (params["conv4_b"] * bn_scale + bn_shift).reshape(1, 1).astype(f32)

    def full(arr):
        nd = arr.ndim
        return pl.BlockSpec(arr.shape, lambda b, _n=nd: (0,) * _n)

    kernel = functools.partial(_bam_kernel, row_shifts, col_shifts)

    out3 = pl.pallas_call(
        kernel,
        out_shape=jax.ShapeDtypeStruct((B, C, HW), f32),
        grid_spec=pltpu.PrefetchScalarGridSpec(
            num_scalar_prefetch=0,
            grid=(B,),                                  # one image per step
            in_specs=[
                pl.BlockSpec((None, C, HW), lambda b: (b, 0, 0)),   # x (bf16)
                full(mask_arr),                          # 9 border masks
                full(fc1_w), full(fc1_b),                # fc1
                full(fc2_w), full(fc2_b),                # fc2
                full(c1_w), full(c1_b),                  # conv1
                full(w2m), full(b2),                     # conv2
                full(w3m), full(b3),                     # conv3
                full(w4_eff), full(c4_eff),              # conv4 + folded BN
            ],
            out_specs=pl.BlockSpec((None, C, HW), lambda b: (b, 0, 0)),
        ),
        compiler_params=pltpu.CompilerParams(
            dimension_semantics=("parallel",),           # batch elems independent
            vmem_limit_bytes=48 * 1024 * 1024),          # fits v7x's 64 MiB VMEM
    )(x3, mask_arr, fc1_w, fc1_b, fc2_w, fc2_b, c1_w, c1_b,
      w2m, b2, w3m, b3, w4_eff, c4_eff)

    return out3.reshape(B, C, H, W)


def init_params(key, C, reduction=16):
    """Deterministic synthetic parameters (PyTorch-like uniform fan-in init)."""
    Cr = C // reduction
    ks = jax.random.split(key, 12)

    def u(k, shape, fan_in):
        bound = float(1.0 / (fan_in ** 0.5))
        return jax.random.uniform(k, shape, jnp.float32, -bound, bound)

    return {
        "fc1_w": u(ks[0], (Cr, C), C),
        "fc1_b": u(ks[1], (Cr,), C),
        "fc2_w": u(ks[2], (C, Cr), Cr),
        "fc2_b": u(ks[3], (C,), Cr),
        "conv1_w": u(ks[4], (Cr, C), C),
        "conv1_b": u(ks[5], (Cr,), C),
        "conv2_w": u(ks[6], (Cr, Cr, 3, 3), Cr * 9),
        "conv2_b": u(ks[7], (Cr,), Cr * 9),
        "conv3_w": u(ks[8], (Cr, Cr, 3, 3), Cr * 9),
        "conv3_b": u(ks[9], (Cr,), Cr * 9),
        "conv4_w": u(ks[10], (Cr,), Cr),            # Conv2d(Cr, 1, 1) weight, squeezed
        "conv4_b": u(ks[11], (1,), Cr),
        "bn_gamma": jnp.ones((1,), jnp.float32),
        "bn_beta": jnp.zeros((1,), jnp.float32),
        "bn_mean": jnp.zeros((1,), jnp.float32),
        "bn_var": jnp.ones((1,), jnp.float32),
    }


def bam_reference(x, p, dilation=4):
    """Pure-JAX reference of the PyTorch forward (eval-mode BN)."""
    eps = 1e-5
    hi = jax.lax.Precision.HIGHEST
    pooled = jnp.mean(x, axis=(2, 3))                                   # (B, C)
    h = jax.nn.relu(jnp.dot(pooled, p["fc1_w"].T, precision=hi) + p["fc1_b"])
    y1 = jax.nn.sigmoid(jnp.dot(h, p["fc2_w"].T, precision=hi) + p["fc2_b"])
    ca = y1[:, :, None, None]                                           # (B,C,1,1)

    t = jnp.einsum("oc,bchw->bohw", p["conv1_w"], x, precision=hi)
    t = t + p["conv1_b"][None, :, None, None]

    def dconv(z, w, b):
        y = jax.lax.conv_general_dilated(
            z, w, window_strides=(1, 1),
            padding=((dilation, dilation), (dilation, dilation)),
            rhs_dilation=(dilation, dilation),
            dimension_numbers=("NCHW", "OIHW", "NCHW"), precision=hi)
        return y + b[None, :, None, None]

    u = dconv(t, p["conv2_w"], p["conv2_b"])
    v = dconv(u, p["conv3_w"], p["conv3_b"])
    s = jnp.einsum("c,bchw->bhw", p["conv4_w"], v, precision=hi)[:, None, :, :]
    s = s + p["conv4_b"][None, :, None, None]
    bn_scale = p["bn_gamma"] / jnp.sqrt(p["bn_var"] + eps)
    bn_shift = p["bn_beta"] - p["bn_mean"] * bn_scale
    s = s * bn_scale[None, :, None, None] + bn_shift[None, :, None, None]
    return jax.nn.sigmoid(ca + s)                                       # (B,C,H,W)


if __name__ == "__main__":
    B, C, H, W = 2, 32, 16, 16            # reduction=16 -> bottleneck channels = 2
    reduction, dilation = 16, 4

    key = jax.random.PRNGKey(0)
    kx, kp = jax.random.split(key)
    x = jax.random.normal(kx, (B, C, H, W), jnp.float32)
    params = init_params(kp, C, reduction)

    out = jax.block_until_ready(bam_forward(x, params, reduction, dilation))
    ref = jax.block_until_ready(bam_reference(x, params, dilation))

    assert out.shape == (B, C, H, W)
    max_err = float(jnp.max(jnp.abs(out - ref)))
    # bf16 x / conv1 inputs + approx EUP reciprocal; accumulation stays f32.
    if max_err > 2e-2:
        raise AssertionError(f"kernel/reference mismatch: max abs err = {max_err}")

    print("KERNEL_OK")
</pallas_src>

<mosaic_0001>
module attributes {stable_mosaic.version = 11 : i64} {
  func.func @_bam_kernel(%arg0: i32, %arg1: memref<1x32x256xbf16, #tpu.memory_space<vmem>>, %arg2: memref<9x256xf32, #tpu.memory_space<vmem>>, %arg3: memref<2x32xf32, #tpu.memory_space<vmem>>, %arg4: memref<2x1xf32, #tpu.memory_space<vmem>>, %arg5: memref<32x2xf32, #tpu.memory_space<vmem>>, %arg6: memref<32x1xf32, #tpu.memory_space<vmem>>, %arg7: memref<2x32xbf16, #tpu.memory_space<vmem>>, %arg8: memref<2x1xf32, #tpu.memory_space<vmem>>, %arg9: memref<9x2x2xf32, #tpu.memory_space<vmem>>, %arg10: memref<2x1xf32, #tpu.memory_space<vmem>>, %arg11: memref<9x2x2xf32, #tpu.memory_space<vmem>>, %arg12: memref<2x1xf32, #tpu.memory_space<vmem>>, %arg13: memref<1x2xf32, #tpu.memory_space<vmem>>, %arg14: memref<1x1xf32, #tpu.memory_space<vmem>>, %arg15: memref<1x32x256xf32, #tpu.memory_space<vmem>>) attributes {dimension_semantics = [#tpu.dimension_semantics<parallel>], iteration_bounds = array<i64: 2>, scalar_prefetch = 0 : i64, scratch_operands = 0 : i64, tpu.core_type = #tpu.core_type<tc>, window_params = [{transform_indices = @transform_0, window_bounds = array<i64: 1, 32, 256>}, {pipeline_mode = #tpu.pipeline_mode<synchronous>, transform_indices = @transform_1, window_bounds = array<i64: 9, 256>}, {pipeline_mode = #tpu.pipeline_mode<synchronous>, transform_indices = @transform_2, window_bounds = array<i64: 2, 32>}, {pipeline_mode = #tpu.pipeline_mode<synchronous>, transform_indices = @transform_3, window_bounds = array<i64: 2, 1>}, {pipeline_mode = #tpu.pipeline_mode<synchronous>, transform_indices = @transform_4, window_bounds = array<i64: 32, 2>}, {pipeline_mode = #tpu.pipeline_mode<synchronous>, transform_indices = @transform_5, window_bounds = array<i64: 32, 1>}, {pipeline_mode = #tpu.pipeline_mode<synchronous>, transform_indices = @transform_6, window_bounds = array<i64: 2, 32>}, {pipeline_mode = #tpu.pipeline_mode<synchronous>, transform_indices = @transform_7, window_bounds = array<i64: 2, 1>}, {pipeline_mode = #tpu.pipeline_mode<synchronous>, transform_indices = @transform_8, window_bounds = array<i64: 9, 2, 2>}, {pipeline_mode = #tpu.pipeline_mode<synchronous>, transform_indices = @transform_9, window_bounds = array<i64: 2, 1>}, {pipeline_mode = #tpu.pipeline_mode<synchronous>, transform_indices = @transform_10, window_bounds = array<i64: 9, 2, 2>}, {pipeline_mode = #tpu.pipeline_mode<synchronous>, transform_indices = @transform_11, window_bounds = array<i64: 2, 1>}, {pipeline_mode = #tpu.pipeline_mode<synchronous>, transform_indices = @transform_12, window_bounds = array<i64: 1, 2>}, {pipeline_mode = #tpu.pipeline_mode<synchronous>, transform_indices = @transform_13, window_bounds = array<i64: 1, 1>}, {transform_indices = @transform_14, window_bounds = array<i64: 1, 32, 256>}]} {
    %c0 = arith.constant 0 : index
    %c0_0 = arith.constant 0 : index
    %c0_1 = arith.constant 0 : index
    %0 = vector.load %arg1[%c0, %c0_0, %c0_1] : memref<1x32x256xbf16, #tpu.memory_space<vmem>>, vector<1x32x256xbf16>
    %1 = vector.shape_cast %0 : vector<1x32x256xbf16> to vector<32x256xbf16>
    %c0_2 = arith.constant 0 : index
    %c0_3 = arith.constant 0 : index
    %2 = vector.load %arg2[%c0_2, %c0_3] : memref<9x256xf32, #tpu.memory_space<vmem>>, vector<9x256xf32>
    %cst = arith.constant 1.000000e+00 : bf16
    %3 = vector.broadcast %cst : bf16 to vector<256x1xbf16>
    %cst_4 = arith.constant dense<0.000000e+00> : vector<32x1xf32>
    %4 = tpu.matmul %1, %3, %cst_4 {dimension_numbers = #tpu.dot_dimension_numbers<[1], [0], [0], [1], [0, 0, 1, 1], [], []>} : vector<32x256xbf16>, vector<256x1xbf16>, vector<32x1xf32> -> vector<32x1xf32>
    %cst_5 = arith.constant 3.906250e-03 : f32
    %5 = vector.broadcast %cst_5 : f32 to vector<32x1xf32>
    %6 = arith.mulf %4, %5 : vector<32x1xf32>
    %c0_6 = arith.constant 0 : index
    %c0_7 = arith.constant 0 : index
    %7 = vector.load %arg3[%c0_6, %c0_7] : memref<2x32xf32, #tpu.memory_space<vmem>>, vector<2x32xf32>
    %cst_8 = arith.constant dense<0.000000e+00> : vector<2x1xf32>
    %8 = tpu.matmul %7, %6, %cst_8 {dimension_numbers = #tpu.dot_dimension_numbers<[1], [0], [0], [1], [0, 0, 1, 1], [], []>} : vector<2x32xf32>, vector<32x1xf32>, vector<2x1xf32> -> vector<2x1xf32>
    %c0_9 = arith.constant 0 : index
    %c0_10 = arith.constant 0 : index
    %9 = vector.load %arg4[%c0_9, %c0_10] : memref<2x1xf32, #tpu.memory_space<vmem>>, vector<2x1xf32>
    %10 = arith.addf %8, %9 : vector<2x1xf32>
    %cst_11 = arith.constant 0.000000e+00 : f32
    %11 = vector.broadcast %cst_11 : f32 to vector<2x1xf32>
    %12 = arith.maximumf %10, %11 : vector<2x1xf32>
    %c0_12 = arith.constant 0 : index
    %c0_13 = arith.constant 0 : index
    %13 = vector.load %arg5[%c0_12, %c0_13] : memref<32x2xf32, #tpu.memory_space<vmem>>, vector<32x2xf32>
    %cst_14 = arith.constant dense<0.000000e+00> : vector<32x1xf32>
    %14 = tpu.matmul %13, %12, %cst_14 {dimension_numbers = #tpu.dot_dimension_numbers<[1], [0], [0], [1], [0, 0, 1, 1], [], []>} : vector<32x2xf32>, vector<2x1xf32>, vector<32x1xf32> -> vector<32x1xf32>
    %c0_15 = arith.constant 0 : index
    %c0_16 = arith.constant 0 : index
    %15 = vector.load %arg6[%c0_15, %c0_16] : memref<32x1xf32, #tpu.memory_space<vmem>>, vector<32x1xf32>
    %16 = arith.addf %14, %15 : vector<32x1xf32>
    %17 = math.absf %16 : vector<32x1xf32>
    %cst_17 = arith.constant 0.000000e+00 : f32
    %18 = vector.broadcast %cst_17 : f32 to vector<32x1xf32>
    %19 = arith.subf %18, %17 : vector<32x1xf32>
    %20 = math.exp %19 : vector<32x1xf32>
    %cst_18 = arith.constant 1.000000e+00 : f32
    %21 = vector.broadcast %cst_18 : f32 to vector<32x1xf32>
    %22 = arith.addf %21, %20 : vector<32x1xf32>
    %23 = tpu.reciprocal %22 {approx = true} : vector<32x1xf32> -> vector<32x1xf32>
    %cst_19 = arith.constant 0.000000e+00 : f32
    %24 = vector.broadcast %cst_19 : f32 to vector<32x1xf32>
    %25 = arith.cmpf oge, %16, %24 : vector<32x1xf32>
    %26 = arith.mulf %20, %23 : vector<32x1xf32>
    %27 = arith.select %25, %23, %26 : vector<32x1xi1>, vector<32x1xf32>
    %c0_20 = arith.constant 0 : index
    %c0_21 = arith.constant 0 : index
    %28 = vector.load %arg7[%c0_20, %c0_21] : memref<2x32xbf16, #tpu.memory_space<vmem>>, vector<2x32xbf16>
    %cst_22 = arith.constant dense<0.000000e+00> : vector<2x256xf32>
    %29 = tpu.matmul %28, %1, %cst_22 {dimension_numbers = #tpu.dot_dimension_numbers<[1], [0], [0], [1], [0, 0, 1, 1], [], []>} : vector<2x32xbf16>, vector<32x256xbf16>, vector<2x256xf32> -> vector<2x256xf32>
    %c0_23 = arith.constant 0 : index
    %c0_24 = arith.constant 0 : index
    %30 = vector.load %arg8[%c0_23, %c0_24] : memref<2x1xf32, #tpu.memory_space<vmem>>, vector<2x1xf32>
    %31 = vector.broadcast %30 : vector<2x1xf32> to vector<2x256xf32>
    %32 = arith.addf %29, %31 : vector<2x256xf32>
    %c0_25 = arith.constant 0 : index
    %c0_26 = arith.constant 0 : index
    %c0_27 = arith.constant 0 : index
    %33 = vector.load %arg9[%c0_25, %c0_26, %c0_27] : memref<9x2x2xf32, #tpu.memory_space<vmem>>, vector<9x2x2xf32>
    %c0_28 = arith.constant 0 : index
    %c0_29 = arith.constant 0 : index
    %34 = vector.load %arg10[%c0_28, %c0_29] : memref<2x1xf32, #tpu.memory_space<vmem>>, vector<2x1xf32>
    %c64_i32 = arith.constant 64 : i32
    %35 = tpu.dynamic_rotate %32 by %c64_i32 dim 1 : vector<2x256xf32>, i32 -> vector<2x256xf32>
    %c192_i32 = arith.constant 192 : i32
    %36 = tpu.dynamic_rotate %32 by %c192_i32 dim 1 : vector<2x256xf32>, i32 -> vector<2x256xf32>
    %37 = vector.extract_strided_slice %33 {offsets = [4, 0, 0], sizes = [1, 2, 2], strides = [1, 1, 1]} : vector<9x2x2xf32> to vector<1x2x2xf32>
    %38 = vector.shape_cast %37 : vector<1x2x2xf32> to vector<2x2xf32>
    %39 = vector.extract_strided_slice %38 {offsets = [0, 0], sizes = [2, 1], strides = [1, 1]} : vector<2x2xf32> to vector<2x1xf32>
    %40 = vector.extract_strided_slice %32 {offsets = [0, 0], sizes = [1, 256], strides = [1, 1]} : vector<2x256xf32> to vector<1x256xf32>
    %41 = vector.broadcast %39 : vector<2x1xf32> to vector<2x256xf32>
    %42 = vector.broadcast %40 : vector<1x256xf32> to vector<2x256xf32>
    %43 = arith.mulf %41, %42 : vector<2x256xf32>
    %44 = vector.extract_strided_slice %38 {offsets = [0, 1], sizes = [2, 1], strides = [1, 1]} : vector<2x2xf32> to vector<2x1xf32>
    %45 = vector.extract_strided_slice %32 {offsets = [1, 0], sizes = [1, 256], strides = [1, 1]} : vector<2x256xf32> to vector<1x256xf32>
    %46 = vector.broadcast %44 : vector<2x1xf32> to vector<2x256xf32>
    %47 = vector.broadcast %45 : vector<1x256xf32> to vector<2x256xf32>
    %48 = arith.mulf %46, %47 : vector<2x256xf32>
    %49 = arith.addf %43, %48 : vector<2x256xf32>
    %50 = vector.broadcast %34 : vector<2x1xf32> to vector<2x256xf32>
    %51 = arith.addf %49, %50 : vector<2x256xf32>
    %c4_i32 = arith.constant 4 : i32
    %52 = tpu.dynamic_rotate %35 by %c4_i32 dim 1 : vector<2x256xf32>, i32 -> vector<2x256xf32>
    %53 = vector.extract_strided_slice %33 {offsets = [0, 0, 0], sizes = [1, 2, 2], strides = [1, 1, 1]} : vector<9x2x2xf32> to vector<1x2x2xf32>
    %54 = vector.shape_cast %53 : vector<1x2x2xf32> to vector<2x2xf32>
    %55 = vector.extract_strided_slice %2 {offsets = [0, 0], sizes = [1, 256], strides = [1, 1]} : vector<9x256xf32> to vector<1x256xf32>
    %56 = vector.broadcast %55 : vector<1x256xf32> to vector<2x256xf32>
    %57 = arith.mulf %52, %56 : vector<2x256xf32>
    %58 = vector.extract_strided_slice %54 {offsets = [0, 0], sizes = [2, 1], strides = [1, 1]} : vector<2x2xf32> to vector<2x1xf32>
    %59 = vector.extract_strided_slice %57 {offsets = [0, 0], sizes = [1, 256], strides = [1, 1]} : vector<2x256xf32> to vector<1x256xf32>
    %60 = vector.broadcast %58 : vector<2x1xf32> to vector<2x256xf32>
    %61 = vector.broadcast %59 : vector<1x256xf32> to vector<2x256xf32>
    %62 = arith.mulf %60, %61 : vector<2x256xf32>
    %63 = vector.extract_strided_slice %54 {offsets = [0, 1], sizes = [2, 1], strides = [1, 1]} : vector<2x2xf32> to vector<2x1xf32>
    %64 = vector.extract_strided_slice %57 {offsets = [1, 0], sizes = [1, 256], strides = [1, 1]} : vector<2x256xf32> to vector<1x256xf32>
    %65 = vector.broadcast %63 : vector<2x1xf32> to vector<2x256xf32>
    %66 = vector.broadcast %64 : vector<1x256xf32> to vector<2x256xf32>
    %67 = arith.mulf %65, %66 : vector<2x256xf32>
    %68 = arith.addf %62, %67 : vector<2x256xf32>
    %69 = arith.addf %51, %68 : vector<2x256xf32>
    %70 = vector.extract_strided_slice %33 {offsets = [1, 0, 0], sizes = [1, 2, 2], strides = [1, 1, 1]} : vector<9x2x2xf32> to vector<1x2x2xf32>
    %71 = vector.shape_cast %70 : vector<1x2x2xf32> to vector<2x2xf32>
    %72 = vector.extract_strided_slice %2 {offsets = [1, 0], sizes = [1, 256], strides = [1, 1]} : vector<9x256xf32> to vector<1x256xf32>
    %73 = vector.broadcast %72 : vector<1x256xf32> to vector<2x256xf32>
    %74 = arith.mulf %35, %73 : vector<2x256xf32>
    %75 = vector.extract_strided_slice %71 {offsets = [0, 0], sizes = [2, 1], strides = [1, 1]} : vector<2x2xf32> to vector<2x1xf32>
    %76 = vector.extract_strided_slice %74 {offsets = [0, 0], sizes = [1, 256], strides = [1, 1]} : vector<2x256xf32> to vector<1x256xf32>
    %77 = vector.broadcast %75 : vector<2x1xf32> to vector<2x256xf32>
    %78 = vector.broadcast %76 : vector<1x256xf32> to vector<2x256xf32>
    %79 = arith.mulf %77, %78 : vector<2x256xf32>
    %80 = vector.extract_strided_slice %71 {offsets = [0, 1], sizes = [2, 1], strides = [1, 1]} : vector<2x2xf32> to vector<2x1xf32>
    %81 = vector.extract_strided_slice %74 {offsets = [1, 0], sizes = [1, 256], strides = [1, 1]} : vector<2x256xf32> to vector<1x256xf32>
    %82 = vector.broadcast %80 : vector<2x1xf32> to vector<2x256xf32>
    %83 = vector.broadcast %81 : vector<1x256xf32> to vector<2x256xf32>
    %84 = arith.mulf %82, %83 : vector<2x256xf32>
    %85 = arith.addf %79, %84 : vector<2x256xf32>
    %86 = arith.addf %69, %85 : vector<2x256xf32>
    %c252_i32 = arith.constant 252 : i32
    %87 = tpu.dynamic_rotate %35 by %c252_i32 dim 1 : vector<2x256xf32>, i32 -> vector<2x256xf32>
    %88 = vector.extract_strided_slice %33 {offsets = [2, 0, 0], sizes = [1, 2, 2], strides = [1, 1, 1]} : vector<9x2x2xf32> to vector<1x2x2xf32>
    %89 = vector.shape_cast %88 : vector<1x2x2xf32> to vector<2x2xf32>
    %90 = vector.extract_strided_slice %2 {offsets = [2, 0], sizes = [1, 256], strides = [1, 1]} : vector<9x256xf32> to vector<1x256xf32>
    %91 = vector.broadcast %90 : vector<1x256xf32> to vector<2x256xf32>
    %92 = arith.mulf %87, %91 : vector<2x256xf32>
    %93 = vector.extract_strided_slice %89 {offsets = [0, 0], sizes = [2, 1], strides = [1, 1]} : vector<2x2xf32> to vector<2x1xf32>
    %94 = vector.extract_strided_slice %92 {offsets = [0, 0], sizes = [1, 256], strides = [1, 1]} : vector<2x256xf32> to vector<1x256xf32>
    %95 = vector.broadcast %93 : vector<2x1xf32> to vector<2x256xf32>
    %96 = vector.broadcast %94 : vector<1x256xf32> to vector<2x256xf32>
    %97 = arith.mulf %95, %96 : vector<2x256xf32>
    %98 = vector.extract_strided_slice %89 {offsets = [0, 1], sizes = [2, 1], strides = [1, 1]} : vector<2x2xf32> to vector<2x1xf32>
    %99 = vector.extract_strided_slice %92 {offsets = [1, 0], sizes = [1, 256], strides = [1, 1]} : vector<2x256xf32> to vector<1x256xf32>
    %100 = vector.broadcast %98 : vector<2x1xf32> to vector<2x256xf32>
    %101 = vector.broadcast %99 : vector<1x256xf32> to vector<2x256xf32>
    %102 = arith.mulf %100, %101 : vector<2x256xf32>
    %103 = arith.addf %97, %102 : vector<2x256xf32>
    %104 = arith.addf %86, %103 : vector<2x256xf32>
    %c4_i32_30 = arith.constant 4 : i32
    %105 = tpu.dynamic_rotate %32 by %c4_i32_30 dim 1 : vector<2x256xf32>, i32 -> vector<2x256xf32>
    %106 = vector.extract_strided_slice %33 {offsets = [3, 0, 0], sizes = [1, 2, 2], strides = [1, 1, 1]} : vector<9x2x2xf32> to vector<1x2x2xf32>
    %107 = vector.shape_cast %106 : vector<1x2x2xf32> to vector<2x2xf32>
    %108 = vector.extract_strided_slice %2 {offsets = [3, 0], sizes = [1, 256], strides = [1, 1]} : vector<9x256xf32> to vector<1x256xf32>
    %109 = vector.broadcast %108 : vector<1x256xf32> to vector<2x256xf32>
    %110 = arith.mulf %105, %109 : vector<2x256xf32>
    %111 = vector.extract_strided_slice %107 {offsets = [0, 0], sizes = [2, 1], strides = [1, 1]} : vector<2x2xf32> to vector<2x1xf32>
    %112 = vector.extract_strided_slice %110 {offsets = [0, 0], sizes = [1, 256], strides = [1, 1]} : vector<2x256xf32> to vector<1x256xf32>
    %113 = vector.broadcast %111 : vector<2x1xf32> to vector<2x256xf32>
    %114 = vector.broadcast %112 : vector<1x256xf32> to vector<2x256xf32>
    %115 = arith.mulf %113, %114 : vector<2x256xf32>
    %116 = vector.extract_strided_slice %107 {offsets = [0, 1], sizes = [2, 1], strides = [1, 1]} : vector<2x2xf32> to vector<2x1xf32>
    %117 = vector.extract_strided_slice %110 {offsets = [1, 0], sizes = [1, 256], strides = [1, 1]} : vector<2x256xf32> to vector<1x256xf32>
    %118 = vector.broadcast %116 : vector<2x1xf32> to vector<2x256xf32>
    %119 = vector.broadcast %117 : vector<1x256xf32> to vector<2x256xf32>
    %120 = arith.mulf %118, %119 : vector<2x256xf32>
    %121 = arith.addf %115, %120 : vector<2x256xf32>
    %122 = arith.addf %104, %121 : vector<2x256xf32>
    %c252_i32_31 = arith.constant 252 : i32
    %123 = tpu.dynamic_rotate %32 by %c252_i32_31 dim 1 : vector<2x256xf32>, i32 -> vector<2x256xf32>
    %124 = vector.extract_strided_slice %33 {offsets = [5, 0, 0], sizes = [1, 2, 2], strides = [1, 1, 1]} : vector<9x2x2xf32> to vector<1x2x2xf32>
    %125 = vector.shape_cast %124 : vector<1x2x2xf32> to vector<2x2xf32>
    %126 = vector.extract_strided_slice %2 {offsets = [5, 0], sizes = [1, 256], strides = [1, 1]} : vector<9x256xf32> to vector<1x256xf32>
    %127 = vector.broadcast %126 : vector<1x256xf32> to vector<2x256xf32>
    %128 = arith.mulf %123, %127 : vector<2x256xf32>
    %129 = vector.extract_strided_slice %125 {offsets = [0, 0], sizes = [2, 1], strides = [1, 1]} : vector<2x2xf32> to vector<2x1xf32>
    %130 = vector.extract_strided_slice %128 {offsets = [0, 0], sizes = [1, 256], strides = [1, 1]} : vector<2x256xf32> to vector<1x256xf32>
    %131 = vector.broadcast %129 : vector<2x1xf32> to vector<2x256xf32>
    %132 = vector.broadcast %130 : vector<1x256xf32> to vector<2x256xf32>
    %133 = arith.mulf %131, %132 : vector<2x256xf32>
    %134 = vector.extract_strided_slice %125 {offsets = [0, 1], sizes = [2, 1], strides = [1, 1]} : vector<2x2xf32> to vector<2x1xf32>
    %135 = vector.extract_strided_slice %128 {offsets = [1, 0], sizes = [1, 256], strides = [1, 1]} : vector<2x256xf32> to vector<1x256xf32>
    %136 = vector.broadcast %134 : vector<2x1xf32> to vector<2x256xf32>
    %137 = vector.broadcast %135 : vector<1x256xf32> to vector<2x256xf32>
    %138 = arith.mulf %136, %137 : vector<2x256xf32>
    %139 = arith.addf %133, %138 : vector<2x256xf32>
    %140 = arith.addf %122, %139 : vector<2x256xf32>
    %c4_i32_32 = arith.constant 4 : i32
    %141 = tpu.dynamic_rotate %36 by %c4_i32_32 dim 1 : vector<2x256xf32>, i32 -> vector<2x256xf32>
    %142 = vector.extract_strided_slice %33 {offsets = [6, 0, 0], sizes = [1, 2, 2], strides = [1, 1, 1]} : vector<9x2x2xf32> to vector<1x2x2xf32>
    %143 = vector.shape_cast %142 : vector<1x2x2xf32> to vector<2x2xf32>
    %144 = vector.extract_strided_slice %2 {offsets = [6, 0], sizes = [1, 256], strides = [1, 1]} : vector<9x256xf32> to vector<1x256xf32>
    %145 = vector.broadcast %144 : vector<1x256xf32> to vector<2x256xf32>
    %146 = arith.mulf %141, %145 : vector<2x256xf32>
    %147 = vector.extract_strided_slice %143 {offsets = [0, 0], sizes = [2, 1], strides = [1, 1]} : vector<2x2xf32> to vector<2x1xf32>
    %148 = vector.extract_strided_slice %146 {offsets = [0, 0], sizes = [1, 256], strides = [1, 1]} : vector<2x256xf32> to vector<1x256xf32>
    %149 = vector.broadcast %147 : vector<2x1xf32> to vector<2x256xf32>
    %150 = vector.broadcast %148 : vector<1x256xf32> to vector<2x256xf32>
    %151 = arith.mulf %149, %150 : vector<2x256xf32>
    %152 = vector.extract_strided_slice %143 {offsets = [0, 1], sizes = [2, 1], strides = [1, 1]} : vector<2x2xf32> to vector<2x1xf32>
    %153 = vector.extract_strided_slice %146 {offsets = [1, 0], sizes = [1, 256], strides = [1, 1]} : vector<2x256xf32> to vector<1x256xf32>
    %154 = vector.broadcast %152 : vector<2x1xf32> to vector<2x256xf32>
    %155 = vector.broadcast %153 : vector<1x256xf32> to vector<2x256xf32>
    %156 = arith.mulf %154, %155 : vector<2x256xf32>
    %157 = arith.addf %151, %156 : vector<2x256xf32>
    %158 = arith.addf %140, %157 : vector<2x256xf32>
    %159 = vector.extract_strided_slice %33 {offsets = [7, 0, 0], sizes = [1, 2, 2], strides = [1, 1, 1]} : vector<9x2x2xf32> to vector<1x2x2xf32>
    %160 = vector.shape_cast %159 : vector<1x2x2xf32> to vector<2x2xf32>
    %161 = vector.extract_strided_slice %2 {offsets = [7, 0], sizes = [1, 256], strides = [1, 1]} : vector<9x256xf32> to vector<1x256xf32>
    %162 = vector.broadcast %161 : vector<1x256xf32> to vector<2x256xf32>
    %163 = arith.mulf %36, %162 : vector<2x256xf32>
    %164 = vector.extract_strided_slice %160 {offsets = [0, 0], sizes = [2, 1], strides = [1, 1]} : vector<2x2xf32> to vector<2x1xf32>
    %165 = vector.extract_strided_slice %163 {offsets = [0, 0], sizes = [1, 256], strides = [1, 1]} : vector<2x256xf32> to vector<1x256xf32>
    %166 = vector.broadcast %164 : vector<2x1xf32> to vector<2x256xf32>
    %167 = vector.broadcast %165 : vector<1x256xf32> to vector<2x256xf32>
    %168 = arith.mulf %166, %167 : vector<2x256xf32>
    %169 = vector.extract_strided_slice %160 {offsets = [0, 1], sizes = [2, 1], strides = [1, 1]} : vector<2x2xf32> to vector<2x1xf32>
    %170 = vector.extract_strided_slice %163 {offsets = [1, 0], sizes = [1, 256], strides = [1, 1]} : vector<2x256xf32> to vector<1x256xf32>
    %171 = vector.broadcast %169 : vector<2x1xf32> to vector<2x256xf32>
    %172 = vector.broadcast %170 : vector<1x256xf32> to vector<2x256xf32>
    %173 = arith.mulf %171, %172 : vector<2x256xf32>
    %174 = arith.addf %168, %173 : vector<2x256xf32>
    %175 = arith.addf %158, %174 : vector<2x256xf32>
    %c252_i32_33 = arith.constant 252 : i32
    %176 = tpu.dynamic_rotate %36 by %c252_i32_33 dim 1 : vector<2x256xf32>, i32 -> vector<2x256xf32>
    %177 = vector.extract_strided_slice %33 {offsets = [8, 0, 0], sizes = [1, 2, 2], strides = [1, 1, 1]} : vector<9x2x2xf32> to vector<1x2x2xf32>
    %178 = vector.shape_cast %177 : vector<1x2x2xf32> to vector<2x2xf32>
    %179 = vector.extract_strided_slice %2 {offsets = [8, 0], sizes = [1, 256], strides = [1, 1]} : vector<9x256xf32> to vector<1x256xf32>
    %180 = vector.broadcast %179 : vector<1x256xf32> to vector<2x256xf32>
    %181 = arith.mulf %176, %180 : vector<2x256xf32>
    %182 = vector.extract_strided_slice %178 {offsets = [0, 0], sizes = [2, 1], strides = [1, 1]} : vector<2x2xf32> to vector<2x1xf32>
    %183 = vector.extract_strided_slice %181 {offsets = [0, 0], sizes = [1, 256], strides = [1, 1]} : vector<2x256xf32> to vector<1x256xf32>
    %184 = vector.broadcast %182 : vector<2x1xf32> to vector<2x256xf32>
    %185 = vector.broadcast %183 : vector<1x256xf32> to vector<2x256xf32>
    %186 = arith.mulf %184, %185 : vector<2x256xf32>
    %187 = vector.extract_strided_slice %178 {offsets = [0, 1], sizes = [2, 1], strides = [1, 1]} : vector<2x2xf32> to vector<2x1xf32>
    %188 = vector.extract_strided_slice %181 {offsets = [1, 0], sizes = [1, 256], strides = [1, 1]} : vector<2x256xf32> to vector<1x256xf32>
    %189 = vector.broadcast %187 : vector<2x1xf32> to vector<2x256xf32>
    %190 = vector.broadcast %188 : vector<1x256xf32> to vector<2x256xf32>
    %191 = arith.mulf %189, %190 : vector<2x256xf32>
    %192 = arith.addf %186, %191 : vector<2x256xf32>
    %193 = arith.addf %175, %192 : vector<2x256xf32>
    %c0_34 = arith.constant 0 : index
    %c0_35 = arith.constant 0 : index
    %c0_36 = arith.constant 0 : index
    %194 = vector.load %arg11[%c0_34, %c0_35, %c0_36] : memref<9x2x2xf32, #tpu.memory_space<vmem>>, vector<9x2x2xf32>
    %c0_37 = arith.constant 0 : index
    %c0_38 = arith.constant 0 : index
    %195 = vector.load %arg12[%c0_37, %c0_38] : memref<2x1xf32, #tpu.memory_space<vmem>>, vector<2x1xf32>
    %c64_i32_39 = arith.constant 64 : i32
    %196 = tpu.dynamic_rotate %193 by %c64_i32_39 dim 1 : vector<2x256xf32>, i32 -> vector<2x256xf32>
    %c192_i32_40 = arith.constant 192 : i32
    %197 = tpu.dynamic_rotate %193 by %c192_i32_40 dim 1 : vector<2x256xf32>, i32 -> vector<2x256xf32>
    %198 = vector.extract_strided_slice %194 {offsets = [4, 0, 0], sizes = [1, 2, 2], strides = [1, 1, 1]} : vector<9x2x2xf32> to vector<1x2x2xf32>
    %199 = vector.shape_cast %198 : vector<1x2x2xf32> to vector<2x2xf32>
    %200 = vector.extract_strided_slice %199 {offsets = [0, 0], sizes = [2, 1], strides = [1, 1]} : vector<2x2xf32> to vector<2x1xf32>
    %201 = vector.extract_strided_slice %193 {offsets = [0, 0], sizes = [1, 256], strides = [1, 1]} : vector<2x256xf32> to vector<1x256xf32>
    %202 = vector.broadcast %200 : vector<2x1xf32> to vector<2x256xf32>
    %203 = vector.broadcast %201 : vector<1x256xf32> to vector<2x256xf32>
    %204 = arith.mulf %202, %203 : vector<2x256xf32>
    %205 = vector.extract_strided_slice %199 {offsets = [0, 1], sizes = [2, 1], strides = [1, 1]} : vector<2x2xf32> to vector<2x1xf32>
    %206 = vector.extract_strided_slice %193 {offsets = [1, 0], sizes = [1, 256], strides = [1, 1]} : vector<2x256xf32> to vector<1x256xf32>
    %207 = vector.broadcast %205 : vector<2x1xf32> to vector<2x256xf32>
    %208 = vector.broadcast %206 : vector<1x256xf32> to vector<2x256xf32>
    %209 = arith.mulf %207, %208 : vector<2x256xf32>
    %210 = arith.addf %204, %209 : vector<2x256xf32>
    %211 = vector.broadcast %195 : vector<2x1xf32> to vector<2x256xf32>
    %212 = arith.addf %210, %211 : vector<2x256xf32>
    %c4_i32_41 = arith.constant 4 : i32
    %213 = tpu.dynamic_rotate %196 by %c4_i32_41 dim 1 : vector<2x256xf32>, i32 -> vector<2x256xf32>
    %214 = vector.extract_strided_slice %194 {offsets = [0, 0, 0], sizes = [1, 2, 2], strides = [1, 1, 1]} : vector<9x2x2xf32> to vector<1x2x2xf32>
    %215 = vector.shape_cast %214 : vector<1x2x2xf32> to vector<2x2xf32>
    %216 = vector.extract_strided_slice %2 {offsets = [0, 0], sizes = [1, 256], strides = [1, 1]} : vector<9x256xf32> to vector<1x256xf32>
    %217 = vector.broadcast %216 : vector<1x256xf32> to vector<2x256xf32>
    %218 = arith.mulf %213, %217 : vector<2x256xf32>
    %219 = vector.extract_strided_slice %215 {offsets = [0, 0], sizes = [2, 1], strides = [1, 1]} : vector<2x2xf32> to vector<2x1xf32>
    %220 = vector.extract_strided_slice %218 {offsets = [0, 0], sizes = [1, 256], strides = [1, 1]} : vector<2x256xf32> to vector<1x256xf32>
    %221 = vector.broadcast %219 : vector<2x1xf32> to vector<2x256xf32>
    %222 = vector.broadcast %220 : vector<1x256xf32> to vector<2x256xf32>
    %223 = arith.mulf %221, %222 : vector<2x256xf32>
    %224 = vector.extract_strided_slice %215 {offsets = [0, 1], sizes = [2, 1], strides = [1, 1]} : vector<2x2xf32> to vector<2x1xf32>
    %225 = vector.extract_strided_slice %218 {offsets = [1, 0], sizes = [1, 256], strides = [1, 1]} : vector<2x256xf32> to vector<1x256xf32>
    %226 = vector.broadcast %224 : vector<2x1xf32> to vector<2x256xf32>
    %227 = vector.broadcast %225 : vector<1x256xf32> to vector<2x256xf32>
    %228 = arith.mulf %226, %227 : vector<2x256xf32>
    %229 = arith.addf %223, %228 : vector<2x256xf32>
    %230 = arith.addf %212, %229 : vector<2x256xf32>
    %231 = vector.extract_strided_slice %194 {offsets = [1, 0, 0], sizes = [1, 2, 2], strides = [1, 1, 1]} : vector<9x2x2xf32> to vector<1x2x2xf32>
    %232 = vector.shape_cast %231 : vector<1x2x2xf32> to vector<2x2xf32>
    %233 = vector.extract_strided_slice %2 {offsets = [1, 0], sizes = [1, 256], strides = [1, 1]} : vector<9x256xf32> to vector<1x256xf32>
    %234 = vector.broadcast %233 : vector<1x256xf32> to vector<2x256xf32>
    %235 = arith.mulf %196, %234 : vector<2x256xf32>
    %236 = vector.extract_strided_slice %232 {offsets = [0, 0], sizes = [2, 1], strides = [1, 1]} : vector<2x2xf32> to vector<2x1xf32>
    %237 = vector.extract_strided_slice %235 {offsets = [0, 0], sizes = [1, 256], strides = [1, 1]} : vector<2x256xf32> to vector<1x256xf32>
    %238 = vector.broadcast %236 : vector<2x1xf32> to vector<2x256xf32>
    %239 = vector.broadcast %237 : vector<1x256xf32> to vector<2x256xf32>
    %240 = arith.mulf %238, %239 : vector<2x256xf32>
    %241 = vector.extract_strided_slice %232 {offsets = [0, 1], sizes = [2, 1], strides = [1, 1]} : vector<2x2xf32> to vector<2x1xf32>
    %242 = vector.extract_strided_slice %235 {offsets = [1, 0], sizes = [1, 256], strides = [1, 1]} : vector<2x256xf32> to vector<1x256xf32>
    %243 = vector.broadcast %241 : vector<2x1xf32> to vector<2x256xf32>
    %244 = vector.broadcast %242 : vector<1x256xf32> to vector<2x256xf32>
    %245 = arith.mulf %243, %244 : vector<2x256xf32>
    %246 = arith.addf %240, %245 : vector<2x256xf32>
    %247 = arith.addf %230, %246 : vector<2x256xf32>
    %c252_i32_42 = arith.constant 252 : i32
    %248 = tpu.dynamic_rotate %196 by %c252_i32_42 dim 1 : vector<2x256xf32>, i32 -> vector<2x256xf32>
    %249 = vector.extract_strided_slice %194 {offsets = [2, 0, 0], sizes = [1, 2, 2], strides = [1, 1, 1]} : vector<9x2x2xf32> to vector<1x2x2xf32>
    %250 = vector.shape_cast %249 : vector<1x2x2xf32> to vector<2x2xf32>
    %251 = vector.extract_strided_slice %2 {offsets = [2, 0], sizes = [1, 256], strides = [1, 1]} : vector<9x256xf32> to vector<1x256xf32>
    %252 = vector.broadcast %251 : vector<1x256xf32> to vector<2x256xf32>
    %253 = arith.mulf %248, %252 : vector<2x256xf32>
    %254 = vector.extract_strided_slice %250 {offsets = [0, 0], sizes = [2, 1], strides = [1, 1]} : vector<2x2xf32> to vector<2x1xf32>
    %255 = vector.extract_strided_slice %253 {offsets = [0, 0], sizes = [1, 256], strides = [1, 1]} : vector<2x256xf32> to vector<1x256xf32>
    %256 = vector.broadcast %254 : vector<2x1xf32> to vector<2x256xf32>
    %257 = vector.broadcast %255 : vector<1x256xf32> to vector<2x256xf32>
    %258 = arith.mulf %256, %257 : vector<2x256xf32>
    %259 = vector.extract_strided_slice %250 {offsets = [0, 1], sizes = [2, 1], strides = [1, 1]} : vector<2x2xf32> to vector<2x1xf32>
    %260 = vector.extract_strided_slice %253 {offsets = [1, 0], sizes = [1, 256], strides = [1, 1]} : vector<2x256xf32> to vector<1x256xf32>
    %261 = vector.broadcast %259 : vector<2x1xf32> to vector<2x256xf32>
    %262 = vector.broadcast %260 : vector<1x256xf32> to vector<2x256xf32>
    %263 = arith.mulf %261, %262 : vector<2x256xf32>
    %264 = arith.addf %258, %263 : vector<2x256xf32>
    %265 = arith.addf %247, %264 : vector<2x256xf32>
    %c4_i32_43 = arith.constant 4 : i32
    %266 = tpu.dynamic_rotate %193 by %c4_i32_43 dim 1 : vector<2x256xf32>, i32 -> vector<2x256xf32>
    %267 = vector.extract_strided_slice %194 {offsets = [3, 0, 0], sizes = [1, 2, 2], strides = [1, 1, 1]} : vector<9x2x2xf32> to vector<1x2x2xf32>
    %268 = vector.shape_cast %267 : vector<1x2x2xf32> to vector<2x2xf32>
    %269 = vector.extract_strided_slice %2 {offsets = [3, 0], sizes = [1, 256], strides = [1, 1]} : vector<9x256xf32> to vector<1x256xf32>
    %270 = vector.broadcast %269 : vector<1x256xf32> to vector<2x256xf32>
    %271 = arith.mulf %266, %270 : vector<2x256xf32>
    %272 = vector.extract_strided_slice %268 {offsets = [0, 0], sizes = [2, 1], strides = [1, 1]} : vector<2x2xf32> to vector<2x1xf32>
    %273 = vector.extract_strided_slice %271 {offsets = [0, 0], sizes = [1, 256], strides = [1, 1]} : vector<2x256xf32> to vector<1x256xf32>
    %274 = vector.broadcast %272 : vector<2x1xf32> to vector<2x256xf32>
    %275 = vector.broadcast %273 : vector<1x256xf32> to vector<2x256xf32>
    %276 = arith.mulf %274, %275 : vector<2x256xf32>
    %277 = vector.extract_strided_slice %268 {offsets = [0, 1], sizes = [2, 1], strides = [1, 1]} : vector<2x2xf32> to vector<2x1xf32>
    %278 = vector.extract_strided_slice %271 {offsets = [1, 0], sizes = [1, 256], strides = [1, 1]} : vector<2x256xf32> to vector<1x256xf32>
    %279 = vector.broadcast %277 : vector<2x1xf32> to vector<2x256xf32>
    %280 = vector.broadcast %278 : vector<1x256xf32> to vector<2x256xf32>
    %281 = arith.mulf %279, %280 : vector<2x256xf32>
    %282 = arith.addf %276, %281 : vector<2x256xf32>
    %283 = arith.addf %265, %282 : vector<2x256xf32>
    %c252_i32_44 = arith.constant 252 : i32
    %284 = tpu.dynamic_rotate %193 by %c252_i32_44 dim 1 : vector<2x256xf32>, i32 -> vector<2x256xf32>
    %285 = vector.extract_strided_slice %194 {offsets = [5, 0, 0], sizes = [1, 2, 2], strides = [1, 1, 1]} : vector<9x2x2xf32> to vector<1x2x2xf32>
    %286 = vector.shape_cast %285 : vector<1x2x2xf32> to vector<2x2xf32>
    %287 = vector.extract_strided_slice %2 {offsets = [5, 0], sizes = [1, 256], strides = [1, 1]} : vector<9x256xf32> to vector<1x256xf32>
    %288 = vector.broadcast %287 : vector<1x256xf32> to vector<2x256xf32>
    %289 = arith.mulf %284, %288 : vector<2x256xf32>
    %290 = vector.extract_strided_slice %286 {offsets = [0, 0], sizes = [2, 1], strides = [1, 1]} : vector<2x2xf32> to vector<2x1xf32>
    %291 = vector.extract_strided_slice %289 {offsets = [0, 0], sizes = [1, 256], strides = [1, 1]} : vector<2x256xf32> to vector<1x256xf32>
    %292 = vector.broadcast %290 : vector<2x1xf32> to vector<2x256xf32>
    %293 = vector.broadcast %291 : vector<1x256xf32> to vector<2x256xf32>
    %294 = arith.mulf %292, %293 : vector<2x256xf32>
    %295 = vector.extract_strided_slice %286 {offsets = [0, 1], sizes = [2, 1], strides = [1, 1]} : vector<2x2xf32> to vector<2x1xf32>
    %296 = vector.extract_strided_slice %289 {offsets = [1, 0], sizes = [1, 256], strides = [1, 1]} : vector<2x256xf32> to vector<1x256xf32>
    %297 = vector.broadcast %295 : vector<2x1xf32> to vector<2x256xf32>
    %298 = vector.broadcast %296 : vector<1x256xf32> to vector<2x256xf32>
    %299 = arith.mulf %297, %298 : vector<2x256xf32>
    %300 = arith.addf %294, %299 : vector<2x256xf32>
    %301 = arith.addf %283, %300 : vector<2x256xf32>
    %c4_i32_45 = arith.constant 4 : i32
    %302 = tpu.dynamic_rotate %197 by %c4_i32_45 dim 1 : vector<2x256xf32>, i32 -> vector<2x256xf32>
    %303 = vector.extract_strided_slice %194 {offsets = [6, 0, 0], sizes = [1, 2, 2], strides = [1, 1, 1]} : vector<9x2x2xf32> to vector<1x2x2xf32>
    %304 = vector.shape_cast %303 : vector<1x2x2xf32> to vector<2x2xf32>
    %305 = vector.extract_strided_slice %2 {offsets = [6, 0], sizes = [1, 256], strides = [1, 1]} : vector<9x256xf32> to vector<1x256xf32>
    %306 = vector.broadcast %305 : vector<1x256xf32> to vector<2x256xf32>
    %307 = arith.mulf %302, %306 : vector<2x256xf32>
    %308 = vector.extract_strided_slice %304 {offsets = [0, 0], sizes = [2, 1], strides = [1, 1]} : vector<2x2xf32> to vector<2x1xf32>
    %309 = vector.extract_strided_slice %307 {offsets = [0, 0], sizes = [1, 256], strides = [1, 1]} : vector<2x256xf32> to vector<1x256xf32>
    %310 = vector.broadcast %308 : vector<2x1xf32> to vector<2x256xf32>
    %311 = vector.broadcast %309 : vector<1x256xf32> to vector<2x256xf32>
    %312 = arith.mulf %310, %311 : vector<2x256xf32>
    %313 = vector.extract_strided_slice %304 {offsets = [0, 1], sizes = [2, 1], strides = [1, 1]} : vector<2x2xf32> to vector<2x1xf32>
    %314 = vector.extract_strided_slice %307 {offsets = [1, 0], sizes = [1, 256], strides = [1, 1]} : vector<2x256xf32> to vector<1x256xf32>
    %315 = vector.broadcast %313 : vector<2x1xf32> to vector<2x256xf32>
    %316 = vector.broadcast %314 : vector<1x256xf32> to vector<2x256xf32>
    %317 = arith.mulf %315, %316 : vector<2x256xf32>
    %318 = arith.addf %312, %317 : vector<2x256xf32>
    %319 = arith.addf %301, %318 : vector<2x256xf32>
    %320 = vector.extract_strided_slice %194 {offsets = [7, 0, 0], sizes = [1, 2, 2], strides = [1, 1, 1]} : vector<9x2x2xf32> to vector<1x2x2xf32>
    %321 = vector.shape_cast %320 : vector<1x2x2xf32> to vector<2x2xf32>
    %322 = vector.extract_strided_slice %2 {offsets = [7, 0], sizes = [1, 256], strides = [1, 1]} : vector<9x256xf32> to vector<1x256xf32>
    %323 = vector.broadcast %322 : vector<1x256xf32> to vector<2x256xf32>
    %324 = arith.mulf %197, %323 : vector<2x256xf32>
    %325 = vector.extract_strided_slice %321 {offsets = [0, 0], sizes = [2, 1], strides = [1, 1]} : vector<2x2xf32> to vector<2x1xf32>
    %326 = vector.extract_strided_slice %324 {offsets = [0, 0], sizes = [1, 256], strides = [1, 1]} : vector<2x256xf32> to vector<1x256xf32>
    %327 = vector.broadcast %325 : vector<2x1xf32> to vector<2x256xf32>
    %328 = vector.broadcast %326 : vector<1x256xf32> to vector<2x256xf32>
    %329 = arith.mulf %327, %328 : vector<2x256xf32>
    %330 = vector.extract_strided_slice %321 {offsets = [0, 1], sizes = [2, 1], strides = [1, 1]} : vector<2x2xf32> to vector<2x1xf32>
    %331 = vector.extract_strided_slice %324 {offsets = [1, 0], sizes = [1, 256], strides = [1, 1]} : vector<2x256xf32> to vector<1x256xf32>
    %332 = vector.broadcast %330 : vector<2x1xf32> to vector<2x256xf32>
    %333 = vector.broadcast %331 : vector<1x256xf32> to vector<2x256xf32>
    %334 = arith.mulf %332, %333 : vector<2x256xf32>
    %335 = arith.addf %329, %334 : vector<2x256xf32>
    %336 = arith.addf %319, %335 : vector<2x256xf32>
    %c252_i32_46 = arith.constant 252 : i32
    %337 = tpu.dynamic_rotate %197 by %c252_i32_46 dim 1 : vector<2x256xf32>, i32 -> vector<2x256xf32>
    %338 = vector.extract_strided_slice %194 {offsets = [8, 0, 0], sizes = [1, 2, 2], strides = [1, 1, 1]} : vector<9x2x2xf32> to vector<1x2x2xf32>
    %339 = vector.shape_cast %338 : vector<1x2x2xf32> to vector<2x2xf32>
    %340 = vector.extract_strided_slice %2 {offsets = [8, 0], sizes = [1, 256], strides = [1, 1]} : vector<9x256xf32> to vector<1x256xf32>
    %341 = vector.broadcast %340 : vector<1x256xf32> to vector<2x256xf32>
    %342 = arith.mulf %337, %341 : vector<2x256xf32>
    %343 = vector.extract_strided_slice %339 {offsets = [0, 0], sizes = [2, 1], strides = [1, 1]} : vector<2x2xf32> to vector<2x1xf32>
    %344 = vector.extract_strided_slice %342 {offsets = [0, 0], sizes = [1, 256], strides = [1, 1]} : vector<2x256xf32> to vector<1x256xf32>
    %345 = vector.broadcast %343 : vector<2x1xf32> to vector<2x256xf32>
    %346 = vector.broadcast %344 : vector<1x256xf32> to vector<2x256xf32>
    %347 = arith.mulf %345, %346 : vector<2x256xf32>
    %348 = vector.extract_strided_slice %339 {offsets = [0, 1], sizes = [2, 1], strides = [1, 1]} : vector<2x2xf32> to vector<2x1xf32>
    %349 = vector.extract_strided_slice %342 {offsets = [1, 0], sizes = [1, 256], strides = [1, 1]} : vector<2x256xf32> to vector<1x256xf32>
    %350 = vector.broadcast %348 : vector<2x1xf32> to vector<2x256xf32>
    %351 = vector.broadcast %349 : vector<1x256xf32> to vector<2x256xf32>
    %352 = arith.mulf %350, %351 : vector<2x256xf32>
    %353 = arith.addf %347, %352 : vector<2x256xf32>
    %354 = arith.addf %336, %353 : vector<2x256xf32>
    %c0_47 = arith.constant 0 : index
    %c0_48 = arith.constant 0 : index
    %355 = vector.load %arg13[%c0_47, %c0_48] : memref<1x2xf32, #tpu.memory_space<vmem>>, vector<1x2xf32>
    %356 = vector.extract_strided_slice %355 {offsets = [0, 0], sizes = [1, 1], strides = [1, 1]} : vector<1x2xf32> to vector<1x1xf32>
    %357 = vector.extract_strided_slice %354 {offsets = [0, 0], sizes = [1, 256], strides = [1, 1]} : vector<2x256xf32> to vector<1x256xf32>
    %358 = vector.broadcast %356 : vector<1x1xf32> to vector<1x256xf32>
    %359 = arith.mulf %358, %357 : vector<1x256xf32>
    %360 = vector.extract_strided_slice %355 {offsets = [0, 1], sizes = [1, 1], strides = [1, 1]} : vector<1x2xf32> to vector<1x1xf32>
    %361 = vector.extract_strided_slice %354 {offsets = [1, 0], sizes = [1, 256], strides = [1, 1]} : vector<2x256xf32> to vector<1x256xf32>
    %362 = vector.broadcast %360 : vector<1x1xf32> to vector<1x256xf32>
    %363 = arith.mulf %362, %361 : vector<1x256xf32>
    %364 = arith.addf %359, %363 : vector<1x256xf32>
    %c0_49 = arith.constant 0 : index
    %c0_50 = arith.constant 0 : index
    %365 = vector.load %arg14[%c0_49, %c0_50] : memref<1x1xf32, #tpu.memory_space<vmem>>, vector<1x1xf32>
    %366 = vector.broadcast %365 : vector<1x1xf32> to vector<1x256xf32>
    %367 = arith.addf %364, %366 : vector<1x256xf32>
    %368 = vector.broadcast %27 : vector<32x1xf32> to vector<32x256xf32>
    %369 = vector.broadcast %367 : vector<1x256xf32> to vector<32x256xf32>
    %370 = arith.addf %368, %369 : vector<32x256xf32>
    %371 = math.absf %370 : vector<32x256xf32>
    %cst_51 = arith.constant 0.000000e+00 : f32
    %372 = vector.broadcast %cst_51 : f32 to vector<32x256xf32>
    %373 = arith.subf %372, %371 : vector<32x256xf32>
    %374 = math.exp %373 : vector<32x256xf32>
    %cst_52 = arith.constant 1.000000e+00 : f32
    %375 = vector.broadcast %cst_52 : f32 to vector<32x256xf32>
    %376 = arith.addf %375, %374 : vector<32x256xf32>
    %377 = tpu.reciprocal %376 {approx = true} : vector<32x256xf32> -> vector<32x256xf32>
    %cst_53 = arith.constant 0.000000e+00 : f32
    %378 = vector.broadcast %cst_53 : f32 to vector<32x256xf32>
    %379 = arith.cmpf oge, %370, %378 : vector<32x256xf32>
    %380 = arith.mulf %374, %377 : vector<32x256xf32>
    %381 = arith.select %379, %377, %380 : vector<32x256xi1>, vector<32x256xf32>
    %c0_54 = arith.constant 0 : index
    %c0_55 = arith.constant 0 : index
    %c0_56 = arith.constant 0 : index
    %382 = vector.load %arg15[%c0_54, %c0_55, %c0_56] : memref<1x32x256xf32, #tpu.memory_space<vmem>>, vector<1x32x256xf32>
    %383 = vector.shape_cast %382 : vector<1x32x256xf32> to vector<32x256xf32>
    %384 = vector.shape_cast %381 : vector<32x256xf32> to vector<1x32x256xf32>
    tpu.vector_store %arg15[%c0_54, %c0_55, %c0_56], %384 {strides = array<i32>} : memref<1x32x256xf32, #tpu.memory_space<vmem>>, vector<1x32x256xf32>,
    return
  }
  func.func @transform_0(%arg0: i32) -> (i32, i32, i32) {
    %c0_i32 = arith.constant 0 : i32
    %c0_i32_0 = arith.constant 0 : i32
    %c0_i32_1 = arith.constant 0 : i32
    return %arg0, %c0_i32, %c0_i32_0 : i32, i32, i32
  }
  func.func @transform_1(%arg0: i32) -> (i32, i32) {
    %c0_i32 = arith.constant 0 : i32
    %c0_i32_0 = arith.constant 0 : i32
    %c0_i32_1 = arith.constant 0 : i32
    return %c0_i32, %c0_i32_0 : i32, i32
  }
  func.func @transform_2(%arg0: i32) -> (i32, i32) {
    %c0_i32 = arith.constant 0 : i32
    %c0_i32_0 = arith.constant 0 : i32
    %c0_i32_1 = arith.constant 0 : i32
    return %c0_i32, %c0_i32_0 : i32, i32
  }
  func.func @transform_3(%arg0: i32) -> (i32, i32) {
    %c0_i32 = arith.constant 0 : i32
    %c0_i32_0 = arith.constant 0 : i32
    %c0_i32_1 = arith.constant 0 : i32
    return %c0_i32, %c0_i32_0 : i32, i32
  }
  func.func @transform_4(%arg0: i32) -> (i32, i32) {
    %c0_i32 = arith.constant 0 : i32
    %c0_i32_0 = arith.constant 0 : i32
    %c0_i32_1 = arith.constant 0 : i32
    return %c0_i32, %c0_i32_0 : i32, i32
  }
  func.func @transform_5(%arg0: i32) -> (i32, i32) {
    %c0_i32 = arith.constant 0 : i32
    %c0_i32_0 = arith.constant 0 : i32
    %c0_i32_1 = arith.constant 0 : i32
    return %c0_i32, %c0_i32_0 : i32, i32
  }
  func.func @transform_6(%arg0: i32) -> (i32, i32) {
    %c0_i32 = arith.constant 0 : i32
    %c0_i32_0 = arith.constant 0 : i32
    %c0_i32_1 = arith.constant 0 : i32
    return %c0_i32, %c0_i32_0 : i32, i32
  }
  func.func @transform_7(%arg0: i32) -> (i32, i32) {
    %c0_i32 = arith.constant 0 : i32
    %c0_i32_0 = arith.constant 0 : i32
    %c0_i32_1 = arith.constant 0 : i32
    return %c0_i32, %c0_i32_0 : i32, i32
  }
  func.func @transform_8(%arg0: i32) -> (i32, i32, i32) {
    %c0_i32 = arith.constant 0 : i32
    %c0_i32_0 = arith.constant 0 : i32
    %c0_i32_1 = arith.constant 0 : i32
    %c0_i32_2 = arith.constant 0 : i32
    return %c0_i32, %c0_i32_0, %c0_i32_1 : i32, i32, i32
  }
  func.func @transform_9(%arg0: i32) -> (i32, i32) {
    %c0_i32 = arith.constant 0 : i32
    %c0_i32_0 = arith.constant 0 : i32
    %c0_i32_1 = arith.constant 0 : i32
    return %c0_i32, %c0_i32_0 : i32, i32
  }
  func.func @transform_10(%arg0: i32) -> (i32, i32, i32) {
    %c0_i32 = arith.constant 0 : i32
    %c0_i32_0 = arith.constant 0 : i32
    %c0_i32_1 = arith.constant 0 : i32
    %c0_i32_2 = arith.constant 0 : i32
    return %c0_i32, %c0_i32_0, %c0_i32_1 : i32, i32, i32
  }
  func.func @transform_11(%arg0: i32) -> (i32, i32) {
    %c0_i32 = arith.constant 0 : i32
    %c0_i32_0 = arith.constant 0 : i32
    %c0_i32_1 = arith.constant 0 : i32
    return %c0_i32, %c0_i32_0 : i32, i32
  }
  func.func @transform_12(%arg0: i32) -> (i32, i32) {
    %c0_i32 = arith.constant 0 : i32
    %c0_i32_0 = arith.constant 0 : i32
    %c0_i32_1 = arith.constant 0 : i32
    return %c0_i32, %c0_i32_0 : i32, i32
  }
  func.func @transform_13(%arg0: i32) -> (i32, i32) {
    %c0_i32 = arith.constant 0 : i32
    %c0_i32_0 = arith.constant 0 : i32
    %c0_i32_1 = arith.constant 0 : i32
    return %c0_i32, %c0_i32_0 : i32, i32
  }
  func.func @transform_14(%arg0: i32) -> (i32, i32, i32) {
    %c0_i32 = arith.constant 0 : i32
    %c0_i32_0 = arith.constant 0 : i32
    %c0_i32_1 = arith.constant 0 : i32
    return %arg0, %c0_i32, %c0_i32_0 : i32, i32, i32
  }
}

</mosaic_0001>

<bundles_post_ra>
// kernel: tpu_custom_call.1
= control target key start
LH: loop header
LB: loop body
LE: loop exit
PB: predicated region body
PF: predicated region fallthrough
CT: control target
= control target key end

     0   :  { %s2864_s0 = inlined_call_operand.vmem [shape: bf16[2,32,256], index: 0, kind: input, shape index: {}]   ;;  %s2865_s1 = inlined_call_operand.vmem [shape: f32[9,256], index: 1, kind: input, shape index: {}]   ;;  %s2866_s2 = inlined_call_operand.vmem [shape: f32[2,32], index: 2, kind: input, shape index: {}]   ;;  %s2867_s3 = inlined_call_operand.vmem [shape: f32[2,1], index: 3, kind: input, shape index: {}]   ;;  %s2868_s4 = inlined_call_operand.vmem [shape: f32[32,2], index: 4, kind: input, shape index: {}]   ;;  %s2869_s5 = inlined_call_operand.vmem [shape: f32[32,1], index: 5, kind: input, shape index: {}]   ;;  %s2870_s6 = inlined_call_operand.vmem [shape: bf16[2,32], index: 6, kind: input, shape index: {}]   ;;  %s2871_s7 = inlined_call_operand.vmem [shape: f32[2,1], index: 7, kind: input, shape index: {}]   ;;  %s2872_s8 = inlined_call_operand.vmem [shape: f32[9,2,2], index: 8, kind: input, shape index: {}]   ;;  %s2873_s9 = inlined_call_operand.vmem [shape: f32[2,1], index: 9, kind: input, shape index: {}]   ;;  %s2874_s10 = inlined_call_operand.vmem [shape: f32[9,2,2], index: 10, kind: input, shape index: {}]   ;;  %s2875_s11 = inlined_call_operand.vmem [shape: f32[2,1], index: 11, kind: input, shape index: {}]   ;;  %s2876_s12 = inlined_call_operand.vmem [shape: f32[1,2], index: 12, kind: input, shape index: {}]   ;;  %s2877_s13 = inlined_call_operand.<no memory space> [shape: f32[1,1], index: 13, kind: input, shape index: {}]   ;;  %s2878_s14 = inlined_call_operand.hbm [shape: f32[2,32,256], index: 14, kind: output, shape index: {}]  }
   0x1   :  { %2889 = sst [smem:[#allocation8_spill]] %s2864_s0  ;;  %v19_v0 = vstv %s2877_s13 }
   0x2   :  { %2890 = sst [smem:[#allocation9_spill]] %s2865_s1  ;;  %20 = vst [vmem:[#allocation2] sm:$0x1] %v19_v0 }
   0x3   :  { %21 = vsyncpa [#allocation4], 0 }
   0x4   :  { %23 = vsyncpa [#allocation4 + $0x1], 0  ;;  %s2206_s15 = smov 0   ;;  %s2208_s16 = smov 0  }
   0x5   :  { %s2210_s17 = smov 0   ;;  %s2212_s18 = smov 0  }
   0x6 LB: > { %s2227_s13 = sadd.s32 4294967295, %s2114_s18   ;;  %s1844_s19 = sadd.s32 4294967294, %s2114_s18   ;;  %s2114_s18 = sphi %s2212_s18, %s2906_s18   ;;  %s2110_s17 = sphi %s2210_s17, %s2905_s17   ;;  %s2106_s16 = sphi %s2208_s16, %s2904_s16   ;;  %s2102_s15 = sphi %s2206_s15, %s2903_s15  }
   0x7   : > { %s2231_s20 = sadd.s32 1, %s2114_s18   ;;  %s335_s21 = sadd.s32 1, %s2110_s17 }
   0x8   : > { %s332_s22 = ssub.s32 %s2114_s18, %s2231_s20  ;;  %p345_p0 = scmp.ne.s32.totalorder %s2110_s17, %s2106_s16 }
   0x9   : > { %p333_p1 = scmp.eq.s32.totalorder %s332_s22, 0  ;;  %p346_p2 = scmp.eq.s32.totalorder %s2227_s13, 1 }
   0xa   : > { %p351_p3 = scmp.ne.s32.totalorder %s2106_s16, %s2102_s15  ;;  %p352_p4 = scmp.eq.s32.totalorder %s1844_s19, 1 }
   0xb   : > { %s2242_s23 = scalar_select %p333_p1, %s2110_s17, %s335_s21  }
   0xc   : > { %p2244_p5 = por %p346_p2, %p345_p0  ;;  %p2248_p6 = por %p352_p4, %p351_p3 }
   0xd   : > { %p1847_p7 = scmp.ge.s32.totalorder %s2114_s18, 1  ;;  %p417_p8 = scmp.lt.s32.totalorder %s2114_s18, 3 }
   0xf   : > { %p418_p9 = pnand %p1847_p7, %p417_p8 }
  0x11   : > { %421 = sbr.rel (%p418_p9) target bundleno = 1341 (0x53d), region = 76 }
  0x18   : > { %p463_p10 = scmp.lt.s32.totalorder %s2227_s13, 1  ;;  %v2116_v1 = vmov 1065369472   ;;  %s2893_s0 = sld [smem:[#allocation8_spill]]  ;;  %v2117_v6 = vmov 0.0|0.0   ;;  %vm2118_vm0 = vmmov 0   ;;  %v839_v59 = vlaneseq }
  0x19   : > { %1871 = vmatprep.subr.bf16.mxu0 %v2116_v1  ;;  %1928 = vmatprep.subr.bf16.mxu1 %v2117_v6  ;;  %v2119_v7 = vmov 0.0   ;;  %v551_v26 = vld [vmem:[%s2866_s2] sm:$0x3]  ;;  %vm553_vm1 = vcmask 261120   ;;  %vm636_vm2 = vcmask 15360   ;;  %v2120_v28 = vmov 0  }
  0x1a   : > { %1872 = vmatpush3.bf16.msra.mxu0 %v2116_v1  ;;  %s464_s26 = scalar_select %p463_p10, %s2227_s13, 1  ;;  %1917 = vmatprep.mubr.msk.f32.mxu1 %vm2118_vm0, %v2119_v7  ;;  %v628_v27 = vld [vmem:[%s2868_s4] sm:$0xff]  ;;  %vm649_vm3 = vcmask 1041408   ;;  %v629_v35 = vld [vmem:[%s2868_s4 + $0x8] sm:$0xff]  ;;  %v630_v36 = vld [vmem:[%s2868_s4 + $0x10] sm:$0xff]  ;;  %v2881_v39 = vmov 1  }
  0x1b   : > { %1873 = vmatprep.subr.bf16.mxu0 %v2116_v1  ;;  %1984 = vset.pattern.permute.xlu0 %v2120_v28  ;;  %v775_v29 = vld [vmem:[%s2871_s7] sm:$0x3]  ;;  %v631_v37 = vld [vmem:[%s2868_s4 + $0x18] sm:$0xff]  ;;  %s2879_s19 = smov 64   ;;  %v829_v51 = vld [vmem:[%s2872_s8 + $0x8] sm:$0x3] }
  0x1c   : > { %s1869_s27 = sshll.u32 %s464_s26, 5  ;;  %1985 = vset.pattern.permute.xlu1 %v2120_v28  ;;  %778 = vperm.xlu0 %1984, %v775_v29   ;;  %v552_v30 = vld [vmem:[%s2867_s3] sm:$0x3]  ;;  %v826_v54 = vld [vmem:[%s2872_s8 + $0x2] sm:$0x3]  ;;  %s2885_s28 = smov 4  }
  0x1d   : > { %v774_v38 = vld [vmem:[%s2870_s6] sm:$0x1]  ;;  %v827_v55 = vld [vmem:[%s2872_s8 + $0x4] sm:$0x3]  ;;  %v828_v56 = vld [vmem:[%s2872_s8 + $0x6] sm:$0x3] }
  0x1e   : > { %s467_s30 = scalar_lea.vmem %s2893_s0, %s1869_s27  ;;  %1874 = vmatpush3.bf16.msra.mxu0 %v2116_v1  ;;  %v825_v52 = vld [vmem:[%s2872_s8] sm:$0x3]  ;;  %v830_v57 = vld [vmem:[%s2872_s8 + $0xa] sm:$0x3]  ;;  %v831_v58 = vld [vmem:[%s2872_s8 + $0xc] sm:$0x3] }
  0x1f   : > { %1875 = vmatprep.subr.bf16.mxu0 %v2116_v1  ;;  %v2259_v2 = vld [vmem:[%s467_s30 + $0x4] ss:$8 sps:$4 sm:$0xff]   ;;  %v1998_v3 = vld [vmem:[%s467_s30] ss:$8 sps:$4 sm:$0xff]   ;;  %v2001_v4 = vld [vmem:[%s467_s30 + $0x14] ss:$8 sps:$4 sm:$0xff]  }
  0x20   : > { %530 = vmatprep.mubr.bf16.mxu0 %v2259_v2  ;;  %v2003_v5 = vld [vmem:[%s467_s30 + $0x10] ss:$8 sps:$4 sm:$0xff]   ;;  %1986 = vset.pattern.permute.xlu0 %v2881_v39  ;;  %v834_v53 = vld [vmem:[%s2873_s9] sm:$0x3]  ;;  %s2883_s22 = smov 124   ;;  %v2347_v60 = vand.u32 127, %v839_v59 }
  0x21   : > { %v832_v0 = vld [vmem:[%s2872_s8 + $0xe] sm:$0x3]  ;;  %s2894_s1 = sld [smem:[#allocation9_spill]]  ;;  %s2895_s26 = smov 64  }
  0x22   : > { %1876 = vmatpush3.bf16.msra.mxu0 %v2116_v1  ;;  %vm841_vm4 = vcmp.lt.s32.totalorder %v2347_v60, 64  ;;  %vm886_vm5 = vcmp.lt.s32.totalorder %v2347_v60, 4  ;;  %vm979_vm6 = vcmp.lt.s32.totalorder %v2347_v60, 124  ;;  %s2897_s21 = smov 4  }
  0x23   : > { %1877 = vmatprep.subr.bf16.mxu0 %v2116_v1 }
  0x26   : > { %1878 = vmatpush3.bf16.msra.mxu0 %v2116_v1 }
  0x27   : > { %1879 = vmatprep.subr.bf16.mxu0 %v2116_v1 }
  0x2a   : > { %1880 = vmatpush3.bf16.msra.mxu0 %v2116_v1 }
  0x2b   : > { %1881 = vmatprep.subr.bf16.mxu0 %v2116_v1 }
  0x2e   : > { %1882 = vmatpush3.bf16.msra.mxu0 %v2116_v1 }
  0x2f   : > { %1883 = vmatprep.subr.bf16.mxu0 %v2116_v1 }
  0x32   : > { %1884 = vmatpush3.bf16.msra.mxu0 %v2116_v1 }
  0x33   : > { %1885 = vmatprep.subr.bf16.mxu0 %v2116_v1 }
  0x36   : > { %1886 = vmatpush3.bf16.msra.mxu0 %v2116_v1 }
  0x39   : > { %531 = vmatmul.mubr.bf16.vlgmr.msra.gmra.mrb[0].mxu0 %v1998_v3 }
  0x3a   : > { %538 = vmatprep.mubr.bf16.mxu0 %v2001_v4 }
  0x41   : > { %539 = vmatmul.mubr.bf16.gmra.mrb[4].mxu0 %v2003_v5 }
  0x9b   : > { %v779_v44 = vpop.permute.xlu0 %778 }
 0x10c   : > { %v1887_v8 = vpop.f32.mrb[0].mxu0 }
 0x10d   : > { %v1888_v9 = vpop.f32.mrb[1].mxu0 }
 0x10e   : > { %v1889_v10 = vadd.f32 %v1888_v9, %v1887_v8  ;;  %v1890_v11 = vpop.f32.mrb[2].mxu0 }
 0x10f   : > { %v1891_v12 = vpop.f32.mrb[3].mxu0 }
 0x110   : > { %v1892_v13 = vadd.f32 %v1891_v12, %v1890_v11  ;;  %v547_v14 = vmul.f32 0.00390625, %v1889_v10 }
 0x112   : > { %v548_v15 = vmul.f32 0.00390625, %v1892_v13 }
 0x114   : > { %v1893_v16 = vpop.f32.mrb[4].mxu0  ;;  %v1929_v17 = vpack.c.bf16 %v548_v15, %v547_v14  ;;  %v850_v14 = vshrl.u32 %v839_v59, 7 }
 0x115   : > { %v1894_v18 = vpop.f32.mrb[5].mxu0 }
 0x116   : > { %v1895_v19 = vadd.f32 %v1894_v18, %v1893_v16  ;;  %v1896_v20 = vpop.f32.mrb[6].mxu0  ;;  %1930 = vmatpush3.bf16.msra.mxu1 %v1929_v17  ;;  %v2388_v17 = vsub.s32 1, %v850_v14  ;;  %v2390_v18 = vsub.s32 0, %v850_v14 }
 0x117   : > { %v1897_v21 = vpop.f32.mrb[7].mxu0  ;;  %1931 = vmatprep.subr.bf16.mxu1 %v2117_v6 }
 0x118   : > { %v1898_v22 = vadd.f32 %v1897_v21, %v1896_v20  ;;  %v549_v23 = vmul.f32 0.00390625, %v1895_v19  ;;  %v474_v19 = vld [vmem:[%s2894_s1] sm:$0xff]  ;;  %v475_v20 = vld [vmem:[%s2894_s1 + $0x8] sm:$0xff] }
 0x11a   : > { %v550_v24 = vmul.f32 0.00390625, %v1898_v22 }
 0x11c   : > { %v1932_v25 = vpack.c.bf16 %v550_v24, %v549_v23  ;;  %v2401_v24 = vrot.slane %v474_v19, %v2388_v17 }
 0x11e   : > { %1933 = vmatpush3.bf16.msra.mxu1 %v1932_v25  ;;  %v2404_v25 = vrot.slane %v475_v20, %v2388_v17 }
 0x121   : > { %1918 = vmatmul.mubr.msk.f32.vlgmr.msra.gmra.mrb[0].mxu1 %vm553_vm1, %v551_v26  ;;  %v1168_v26 = vsub.s32 7, %v850_v14 }
 0x122   : > { %1922 = vmatprep.mubr.msk.f32.mxu1 %vm636_vm2, %v628_v27 }
 0x1f4   : > { %v623_v31 = vpop.f32.mrb[0].mxu1 }
 0x1f5   : > { %v624_v32 = vadd.f32 %v623_v31, %v552_v30  ;;  %v1919_v33 = vpop.f32.mrb[1].mxu1  ;;  %v1033_v31 = vsub.s32 3, %v850_v14 }
 0x1f7   : > { %v627_v34 = vmax.f32 %v624_v32, 0.0  ;;  %v1082_v32 = vsub.s32 5, %v850_v14 }
 0x1f9   : > { %1920 = vmatprep.subr.msk.mxu1 %vm649_vm3, %v627_v34 }
 0x1fa   : > { %1921 = vmatpush3.msk.msra.mxu1 %vm649_vm3, %v627_v34 }
 0x1fb   : > { %1923 = vmatmul.mubr.msk.f32.vlgmr.msra.gmra.mrb[2].mxu1 %vm636_vm2, %v629_v35  ;;  %784 = vmatprep.subr.bf16.mxu1 %v2259_v2  ;;  %v833_v2 = vld [vmem:[%s2872_s8 + $0x10] sm:$0x3] }
 0x1fc   : > { %785 = vmatpush1.bf16.msra.mxu1 %v1998_v3  ;;  %1925 = vmatprep.mubr.msk.f32.mxu1 %vm636_vm2, %v630_v36 }
 0x1fd   : > { %786 = vmatprep.subr.bf16.mxu1 %v2001_v4 }
 0x1ff   : > { %1926 = vmatmul.mubr.msk.f32.gmra.mrb[4].mxu1 %vm636_vm2, %v631_v37 }
 0x200   : > { %787 = vmatpush1.bf16.msra.mxu1 %v2003_v5  ;;  %816 = vmatprep.mubr.bf16.mxu1 %v2120_v28 }
 0x203   : > { %1861 = vmatmul.mubr.msk.bf16.vlgmr.msra.gmra.mrb[8].mxu1 %vm553_vm1, %v774_v38 }
 0x2ce   : > { %v2297_v40 = vpop.f32.mrb[2].mxu1 }
 0x2cf   : > { %v2299_v41 = vpop.f32.mrb[3].mxu1 }
 0x2d2   : > { %v2301_v42 = vpop.f32.mrb[4].mxu1 }
 0x2d3   : > { %v2303_v43 = vpop.f32.mrb[5].mxu1 }
 0x2d6   : > { %v818_v45 = vpop.f32.mrb[8].mxu1 }
 0x2d7   : > { %v2305_v46 = vadd.f32 %v818_v45, %v779_v44  ;;  %v820_v47 = vpop.f32.mrb[9].mxu1 }
 0x2d8   : > { %v2307_v48 = vadd.f32 %v820_v47, %v779_v44  ;;  %v822_v49 = vpop.f32.mrb[10].mxu1  ;;  %v2422_v47 = vrot.slane %v475_v20, %v1033_v31 }
 0x2d9   : > { %v823_v50 = vpop.f32.mrb[11].mxu1  ;;  %835 = vrot.lane.b32.xlu0 %v2305_v46, %s2879_s19  ;;  %v866_v23 = vrot.slane %v2305_v46, %v2388_v17  ;;  %v852_v29 = vrot.slane %v2305_v46, %v2390_v18  ;;  %v2424_v49 = vrot.slane %v474_v19, %v1168_v26 }
 0x2da   : > { %837 = vrot.lane.b32.xlu1 %v2307_v48, %s2879_s19  ;;  %v870_v27 = vrot.slane %v2307_v48, %v2388_v17  ;;  %v856_v30 = vrot.slane %v2307_v48, %v2390_v18  ;;  %s1870_s19 = sshll.u32 %s2227_s13, 10 }
 0x2dd   : > { %860 = vperm.xlu0 %1986, %v829_v51  }
 0x2de   : > { %846 = vperm.xlu1 %1985, %v829_v51  }
 0x2e1   : > { %1988 = vset.pattern.permute.xlu0 %v2120_v28 }
 0x2e2   : > { %901 = vperm.xlu1 %1985, %v825_v52   ;;  %877 = vperm.xlu0 %1988, %v834_v53   ;;  %v2432_v53 = vrot.slane %v475_v20, %v1168_v26 }
 0x2e6   : > { %1987 = vset.pattern.permute.xlu1 %v2881_v39  ;;  %944 = vperm.xlu0 %1988, %v826_v54  }
 0x2e7   : > { %915 = vperm.xlu1 %1987, %v825_v52   ;;  %v2430_v52 = vrot.slane %v474_v19, %v1082_v32 }
 0x2ea   : > { %994 = vperm.xlu0 %1988, %v827_v55  }
 0x2eb   : > { %958 = vperm.xlu1 %1987, %v826_v54  }
 0x2ee   : > { %1043 = vperm.xlu0 %1988, %v828_v56  }
 0x2ef   : > { %1008 = vperm.xlu1 %1987, %v827_v55  }
 0x2f2   : > { %1025 = vrot.lane.b32.xlu0 %v2305_v46, %s2885_s28 }
 0x2f3   : > { %1057 = vperm.xlu1 %1987, %v828_v56   ;;  %v2434_v56 = vrot.slane %v475_v20, %v1082_v32 }
 0x2f6   : > { %1092 = vperm.xlu0 %1988, %v830_v57  }
 0x2f7   : > { %1106 = vperm.xlu1 %1987, %v830_v57   ;;  %v984_v57 = vsub.s32 2, %v850_v14 }
 0x2f9   : > { %v2454_v32 = vrot.slane %v475_v20, %v984_v57 }
 0x2fa   : > { %1074 = vrot.lane.b32.xlu0 %v2305_v46, %s2883_s22  ;;  %v2420_v46 = vrot.slane %v474_v19, %v1033_v31  ;;  %v2452_v31 = vrot.slane %v474_v19, %v984_v57 }
 0x2fb   : > { %1149 = vperm.xlu1 %1987, %v831_v58  }
 0x2fe   : > { %1135 = vperm.xlu0 %1988, %v831_v58  }
 0x2ff   : > { %1027 = vrot.lane.b32.xlu1 %v2307_v48, %s2885_s28 }
 0x303   : > { %1076 = vrot.lane.b32.xlu1 %v2307_v48, %s2883_s22  ;;  %v1125_v48 = vsub.s32 6, %v850_v14 }
 0x34b   : > { %v836_v61 = vpop.permute.xlu0 %835 }
 0x34c   : > { %v838_v62 = vpop.permute.xlu1 %837 }
 0x34d   : > { %v2352_v63 = vsel %vm841_vm4, %v838_v62, %v836_v61  ;;  %v2363_v1 = vsel %vm841_vm4, %v836_v61, %v838_v62  ;;  %v2439_v62 = vrot.slane %v474_v19, %v2390_v18 }
 0x34e   : > { %975 = vrot.lane.b32.xlu0 %v2352_v63, %s2883_s22  ;;  %882 = vrot.lane.b32.xlu1 %v2352_v63, %s2885_s28  ;;  %v940_v37 = vmul.f32 %v2401_v24, %v2352_v63  ;;  %v941_v38 = vmul.f32 %v2404_v25, %v2363_v1 }
 0x350   : > { %v964_v58 = vrot.slane %v940_v37, %v2388_v17  ;;  %v968_v59 = vrot.slane %v941_v38, %v2388_v17  ;;  %v950_v14 = vrot.slane %v940_v37, %v2390_v18 }
 0x352   : > { %1178 = vperm.xlu0 %1988, %v832_v0   ;;  %884 = vrot.lane.b32.xlu1 %v2363_v1, %s2885_s28 }
 0x356   : > { %1221 = vperm.xlu0 %1988, %v833_v2   ;;  %977 = vrot.lane.b32.xlu1 %v2363_v1, %s2883_s22  ;;  %s2813_s22 = scalar_lea.hbm %s2878_s14, %s1870_s19 }
 0x35a   : > { %1192 = vperm.xlu1 %1987, %v832_v0   ;;  %v2442_v0 = vrot.slane %v475_v20, %v2390_v18 }
 0x35c   : > { %v861_v7 = vpop.permute.xlu0 %860 }
 0x35d   : > { %v847_v3 = vpop.permute.xlu1 %846  ;;  %v871_v33 = vmul.f32 %v866_v23, %v861_v7  ;;  %v872_v34 = vmul.f32 %v870_v27, %v861_v7  ;;  %v2446_v7 = vrot.slane %v474_v19, %v1125_v48 }
 0x35e   : > { %1235 = vperm.xlu1 %1987, %v833_v2   ;;  %v857_v35 = vmul.f32 %v852_v29, %v847_v3  ;;  %v858_v36 = vmul.f32 %v856_v30, %v847_v3 }
 0x360   : > { %v874_v54 = vadd.f32 %v872_v34, %v858_v36  ;;  %v873_v55 = vadd.f32 %v871_v33, %v857_v35 }
 0x361   : > { %v2372_v4 = vpop.permute.xlu1 %901  ;;  %v878_v9 = vpop.permute.xlu0 %877 }
 0x362   : > { %v880_v27 = vadd.f32 %v878_v9, %v873_v55  ;;  %v881_v29 = vadd.f32 %v878_v9, %v874_v54 }
 0x365   : > { %v945_v11 = vpop.permute.xlu0 %944 }
 0x366   : > { %v2374_v5 = vpop.permute.xlu1 %915  ;;  %v955_v33 = vmul.f32 %v950_v14, %v945_v11 }
 0x369   : > { %v2382_v13 = vpop.permute.xlu0 %994 }
 0x36a   : > { %v959_v6 = vpop.permute.xlu1 %958 }
 0x36b   : > { %v969_v23 = vmul.f32 %v964_v58, %v959_v6  ;;  %v970_v26 = vmul.f32 %v968_v59, %v959_v6 }
 0x36d   : > { %v2386_v16 = vpop.permute.xlu0 %1043 }
 0x36e   : > { %v2376_v8 = vpop.permute.xlu1 %1008 }
 0x371   : > { %v1026_v22 = vpop.permute.xlu0 %1025 }
 0x372   : > { %v2378_v10 = vpop.permute.xlu1 %1057 }
 0x375   : > { %v2418_v45 = vpop.permute.xlu0 %1092 }
 0x376   : > { %v2380_v12 = vpop.permute.xlu1 %1106 }
 0x379   : > { %v1075_v30 = vpop.permute.xlu0 %1074 }
 0x37a   : > { %v2384_v15 = vpop.permute.xlu1 %1149 }
 0x37d   : > { %v1136_v57 = vpop.permute.xlu0 %1135 }
 0x37e   : > { %v1028_v21 = vpop.permute.xlu1 %1027 }
 0x37f   : > { %v1029_v50 = vsel %vm886_vm5, %v1026_v22, %v1028_v21  ;;  %v1030_v51 = vsel %vm886_vm5, %v1028_v21, %v1026_v22  ;;  %v2448_v21 = vrot.slane %v475_v20, %v1125_v48  ;;  %v954_v22 = vrot.slane %v941_v38, %v2390_v18 }
 0x380   : > { %v1039_v2 = vmul.f32 %v2420_v46, %v1030_v51  ;;  %v1040_v3 = vmul.f32 %v2422_v47, %v1029_v50  ;;  %v971_v20 = vadd.f32 %v969_v23, %v955_v33 }
 0x381   : > { %v956_v34 = vmul.f32 %v954_v22, %v945_v11 }
 0x382   : > { %v1077_v44 = vpop.permute.xlu1 %1076  ;;  %v1049_v38 = vrot.slane %v1039_v2, %v2390_v18  ;;  %v1053_v6 = vrot.slane %v1040_v3, %v2390_v18  ;;  %v1063_v51 = vrot.slane %v1039_v2, %v2388_v17 }
 0x383   : > { %v1078_v35 = vsel %vm979_vm6, %v1075_v30, %v1077_v44  ;;  %v1079_v36 = vsel %vm979_vm6, %v1077_v44, %v1075_v30  ;;  %v972_v48 = vadd.f32 %v970_v26, %v956_v34  ;;  %v1067_v44 = vrot.slane %v1040_v3, %v2388_v17 }
 0x384   : > { %v1088_v54 = vmul.f32 %v2430_v52, %v1078_v35  ;;  %v1089_v55 = vmul.f32 %v2434_v56, %v1079_v36  ;;  %v1054_v22 = vmul.f32 %v1049_v38, %v2386_v16  ;;  %v1055_v23 = vmul.f32 %v1053_v6, %v2386_v16 }
 0x385   : > { %v1068_v36 = vmul.f32 %v1063_v51, %v2378_v10 }
 0x386   : > { %v1098_v38 = vrot.slane %v1088_v54, %v2390_v18  ;;  %v1102_v16 = vrot.slane %v1089_v55, %v2390_v18 }
 0x3c0   : > { %v883_v61 = vpop.permute.xlu1 %882  ;;  %v976_v6 = vpop.permute.xlu0 %975 }
 0x3c4   : > { %v885_v37 = vpop.permute.xlu1 %884 }
 0x3c5   : > { %v887_v9 = vsel %vm886_vm5, %v883_v61, %v885_v37  ;;  %v888_v19 = vsel %vm886_vm5, %v885_v37, %v883_v61  ;;  %v1069_v37 = vmul.f32 %v1067_v44, %v2378_v10 }
 0x3c6   : > { %v897_v11 = vmul.f32 %v2439_v62, %v888_v19  ;;  %v898_v50 = vmul.f32 %v2442_v0, %v887_v9  ;;  %v1131_v2 = vmul.f32 %v2446_v7, %v887_v9  ;;  %v1132_v3 = vmul.f32 %v2448_v21, %v888_v19 }
 0x3c8   : > { %v907_v58 = vrot.slane %v897_v11, %v2390_v18  ;;  %v911_v59 = vrot.slane %v898_v50, %v2390_v18  ;;  %v921_v61 = vrot.slane %v897_v11, %v2388_v17  ;;  %v925_v14 = vrot.slane %v898_v50, %v2388_v17  ;;  %v978_v26 = vpop.permute.xlu1 %977 }
 0x3c9   : > { %v980_v11 = vsel %vm979_vm6, %v976_v6, %v978_v26  ;;  %v1112_v50 = vrot.slane %v1088_v54, %v2388_v17 }
 0x3ca   : > { %v912_v30 = vmul.f32 %v907_v58, %v2372_v4  ;;  %v913_v33 = vmul.f32 %v911_v59, %v2372_v4  ;;  %v926_v34 = vmul.f32 %v921_v61, %v2374_v5  ;;  %v927_v35 = vmul.f32 %v925_v14, %v2374_v5 }
 0x3cb   : > { %v981_v4 = vsel %vm979_vm6, %v978_v26, %v976_v6  ;;  %v1116_v5 = vrot.slane %v1089_v55, %v2388_v17  ;;  %v990_v51 = vmul.f32 %v2452_v31, %v980_v11  ;;  %v1141_v59 = vrot.slane %v1131_v2, %v2390_v18 }
 0x3cc   : > { %v928_v9 = vadd.f32 %v926_v34, %v912_v30  ;;  %v929_v19 = vadd.f32 %v927_v35, %v913_v33  ;;  %v991_v10 = vmul.f32 %v2454_v32, %v981_v4  ;;  %v1145_v61 = vrot.slane %v1132_v3, %v2390_v18 }
 0x3cd   : > { %v1000_v14 = vrot.slane %v990_v51, %v2390_v18  ;;  %v1014_v26 = vrot.slane %v990_v51, %v2388_v17  ;;  %v1155_v55 = vrot.slane %v1131_v2, %v2388_v17  ;;  %v1159_v33 = vrot.slane %v1132_v3, %v2388_v17 }
 0x3ce   : > { %v930_v44 = vadd.f32 %v928_v9, %v880_v27  ;;  %v931_v58 = vadd.f32 %v929_v19, %v881_v29  ;;  %v1004_v30 = vrot.slane %v991_v10, %v2390_v18  ;;  %v1018_v54 = vrot.slane %v991_v10, %v2388_v17 }
 0x3cf   : > { %v1005_v27 = vmul.f32 %v1000_v14, %v2382_v13  ;;  %v1019_v6 = vmul.f32 %v1014_v26, %v2376_v8  ;;  %v1103_v19 = vmul.f32 %v1098_v38, %v2418_v45  ;;  %v1104_v51 = vmul.f32 %v1102_v16, %v2418_v45  ;;  %v2519_v45 = vld [vmem:[%s2894_s1 + $0x10] ss:$0 sm:$0xff] }
 0x3d0   : > { %v973_v34 = vadd.f32 %v971_v20, %v930_v44  ;;  %v974_v35 = vadd.f32 %v972_v48, %v931_v58  ;;  %v1006_v29 = vmul.f32 %v1004_v30, %v2382_v13  ;;  %v1020_v9 = vmul.f32 %v1018_v54, %v2376_v8 }
 0x3d1   : > { %v1117_v10 = vmul.f32 %v1112_v50, %v2380_v12  ;;  %v1118_v2 = vmul.f32 %v1116_v5, %v2380_v12  ;;  %v1021_v39 = vadd.f32 %v1019_v6, %v1005_v27  ;;  %v1174_v20 = vmul.f32 %v2424_v49, %v2363_v1  ;;  %v2524_v12 = vld [vmem:[%s2894_s1 + $0x18] ss:$0 sm:$0xff]  ;;  %v1179_v38 = vpop.permute.xlu0 %1178 }
 0x3d2   : > { %v1022_v3 = vadd.f32 %v1020_v9, %v1006_v29  ;;  %v1175_v13 = vmul.f32 %v2432_v53, %v2352_v63  ;;  %v1070_v48 = vadd.f32 %v1068_v36, %v1054_v22  ;;  %v1071_v44 = vadd.f32 %v1069_v37, %v1055_v23 }
 0x3d3   : > { %v1146_v58 = vmul.f32 %v1141_v59, %v1136_v57  ;;  %v1147_v8 = vmul.f32 %v1145_v61, %v1136_v57  ;;  %v1160_v1 = vmul.f32 %v1155_v55, %v2384_v15  ;;  %v1161_v16 = vmul.f32 %v1159_v33, %v2384_v15 }
 0x3d4   : > { %v1023_v63 = vadd.f32 %v1021_v39, %v973_v34  ;;  %v1024_v22 = vadd.f32 %v1022_v3, %v974_v35  ;;  %v1119_v23 = vadd.f32 %v1117_v10, %v1103_v19  ;;  %v1120_v36 = vadd.f32 %v1118_v2, %v1104_v51 }
 0x3d5   : > { %v1217_v57 = vmul.f32 %v2519_v45, %v981_v4  ;;  %v1218_v37 = vmul.f32 %v2524_v12, %v980_v11  ;;  %v1184_v59 = vrot.slane %v1174_v20, %v2390_v18  ;;  %v1188_v61 = vrot.slane %v1175_v13, %v2390_v18  ;;  %v1222_v4 = vpop.permute.xlu0 %1221 }
 0x3d6   : > { %v1072_v50 = vadd.f32 %v1070_v48, %v1023_v63  ;;  %v1073_v5 = vadd.f32 %v1071_v44, %v1024_v22  ;;  %v1202_v14 = vrot.slane %v1175_v13, %v2388_v17  ;;  %v1198_v30 = vrot.slane %v1174_v20, %v2388_v17  ;;  %v1256_v22 = vld [vmem:[%s2874_s10 + $0x8] sm:$0x3] }
 0x3d7   : > { %v1162_v26 = vadd.f32 %v1160_v1, %v1146_v58  ;;  %v1163_v15 = vadd.f32 %v1161_v16, %v1147_v8  ;;  %v1189_v33 = vmul.f32 %v1184_v59, %v1179_v38  ;;  %v1190_v34 = vmul.f32 %v1188_v61, %v1179_v38  ;;  %v1257_v61 = vld [vmem:[%s2874_s10 + $0xa] sm:$0x3] }
 0x3d8   : > { %v1121_v54 = vadd.f32 %v1119_v23, %v1072_v50  ;;  %v1122_v55 = vadd.f32 %v1120_v36, %v1073_v5  ;;  %v1227_v27 = vrot.slane %v1217_v57, %v2390_v18  ;;  %v1231_v29 = vrot.slane %v1218_v37, %v2390_v18  ;;  %v1252_v23 = vld [vmem:[%s2874_s10] sm:$0x3]  ;;  %v1254_v50 = vld [vmem:[%s2874_s10 + $0x4] sm:$0x3]  ;;  %v1258_v5 = vld [vmem:[%s2874_s10 + $0xc] sm:$0x3] }
 0x3d9   : > { %v1193_v39 = vpop.permute.xlu1 %1192  ;;  %v1241_v6 = vrot.slane %v1217_v57, %v2388_v17  ;;  %v1245_v9 = vrot.slane %v1218_v37, %v2388_v17  ;;  %v1261_v36 = vld [vmem:[%s2875_s11] sm:$0x3]  ;;  %v1253_v57 = vld [vmem:[%s2874_s10 + $0x2] sm:$0x3]  ;;  %v1255_v37 = vld [vmem:[%s2874_s10 + $0x6] sm:$0x3] }
 0x3da   : > { %v1203_v35 = vmul.f32 %v1198_v30, %v1193_v39  ;;  %v1204_v11 = vmul.f32 %v1202_v14, %v1193_v39  ;;  %v1164_v19 = vadd.f32 %v1162_v26, %v1121_v54  ;;  %v1165_v51 = vadd.f32 %v1163_v15, %v1122_v55  ;;  %v634_v14 = vld [vmem:[%s2869_s5 + $0x10] sm:$0xff]  ;;  %v632_v26 = vld [vmem:[%s2869_s5] sm:$0xff]  ;;  %v633_v54 = vld [vmem:[%s2869_s5 + $0x8] sm:$0xff] }
 0x3db   : > { %v1232_v3 = vmul.f32 %v1227_v27, %v1222_v4  ;;  %v1233_v20 = vmul.f32 %v1231_v29, %v1222_v4  ;;  %v2896_v59 = vmov 1   ;;  %v2587_v30 = vadd.f32 %v2303_v43, %v634_v14 }
 0x3dc   : > { %v1205_v10 = vadd.f32 %v1203_v35, %v1189_v33  ;;  %v1206_v2 = vadd.f32 %v1204_v11, %v1190_v34  ;;  %v2594_v39 = vadd.f32 %v2299_v41, %v632_v26  ;;  %v2600_v33 = vadd.f32 %v2297_v40, %v633_v54  ;;  %v635_v34 = vld [vmem:[%s2869_s5 + $0x18] sm:$0xff] }
 0x3dd   : > { %v1236_v13 = vpop.permute.xlu1 %1235  ;;  %v740_v15 = vand.u32 2147483647, %v2587_v30  ;;  %v2608_v41 = vadd.f32 %v2301_v42, %v635_v34  ;;  %vm764_vm7 = vcmp.ge.f32.partialorder %v2587_v30, 0.0 }
 0x3de   : > { %v1207_v48 = vadd.f32 %v1205_v10, %v1164_v19  ;;  %v1208_v44 = vadd.f32 %v1206_v2, %v1165_v51  ;;  %v1246_v58 = vmul.f32 %v1241_v6, %v1236_v13  ;;  %v1247_v8 = vmul.f32 %v1245_v9, %v1236_v13 }
 0x3df   : > { %v744_v55 = vsub.f32 0.0, %v740_v15  ;;  %v738_v43 = vand.u32 2147483647, %v2594_v39  ;;  %v739_v35 = vand.u32 2147483647, %v2600_v33  ;;  %vm762_vm8 = vcmp.ge.f32.partialorder %v2594_v39, 0.0 }
 0x3e0   : > { %v1248_v38 = vadd.f32 %v1246_v58, %v1232_v3  ;;  %v1249_v1 = vadd.f32 %v1247_v8, %v1233_v20  ;;  %v741_v6 = vand.u32 2147483647, %v2608_v41  ;;  %vm763_vm9 = vcmp.ge.f32.partialorder %v2600_v33, 0.0 }
 0x3e1   : > { %v750_v4 = vmul.f32 1.442695, %v744_v55  ;;  %v742_v11 = vsub.f32 0.0, %v738_v43  ;;  %v743_v27 = vsub.f32 0.0, %v739_v35  ;;  %vm765_vm10 = vcmp.ge.f32.partialorder %v2608_v41, 0.0 }
 0x3e2   : > { %v2538_v16 = vadd.f32 %v1248_v38, %v1207_v48  ;;  %v2540_v63 = vadd.f32 %v1249_v1, %v1208_v44  ;;  %v745_v9 = vsub.f32 0.0, %v741_v6  ;;  %v1259_v48 = vld [vmem:[%s2874_s10 + $0xe] sm:$0x3]  ;;  %v1610_v38 = vld [vmem:[%s2876_s12] sm:$0x1] }
 0x3e3   : > { %2004 = vpow2.f32 %v750_v4  ;;  %v746_v29 = vmul.f32 1.442695, %v742_v11  ;;  %v748_v40 = vmul.f32 1.442695, %v743_v27 }
 0x3e4   : > { %1264 = vrot.lane.b32.xlu1 %v2540_v63, %s2895_s26  ;;  %1262 = vrot.lane.b32.xlu0 %v2538_v16, %s2895_s26  ;;  %s2898_s26 = smov 124   ;;  %v752_v3 = vmul.f32 1.442695, %v745_v9 }
 0x3e5   : > { %2006 = vpow2.f32 %v746_v29 }
 0x3e6   : > { %2008 = vpow2.f32 %v748_v40 }
 0x3e7   : > { %2010 = vpow2.f32 %v752_v3  ;;  %v1290_v3 = vrot.slane %v2538_v16, %v2388_v17 }
 0x3e8   : > { %1284 = vperm.xlu1 %1987, %v1256_v22   ;;  %1270 = vperm.xlu0 %1988, %v1256_v22   ;;  %v1260_v22 = vld [vmem:[%s2874_s10 + $0x10] sm:$0x3] }
 0x3ec   : > { %1330 = vperm.xlu1 %1987, %v1252_v23   ;;  %1316 = vperm.xlu0 %1988, %v1252_v23  }
 0x3ed   : > { %v2005_v42 = vpop.eup %2004 }
 0x3ee   : > { %v756_v20 = vadd.f32 1.0, %v2005_v42 }
 0x3ef   : > { %v2007_v13 = vpop.eup %2006 }
 0x3f0   : > { %1989 = vset.pattern.permute.xlu1 %v2120_v28  ;;  %1301 = vperm.xlu0 %1988, %v1261_v36   ;;  %2012 = vrcp.f32 %v756_v20  ;;  %v754_v44 = vadd.f32 1.0, %v2007_v13  ;;  %v2009_v58 = vpop.eup %2008  ;;  %v1294_v20 = vrot.slane %v2540_v63, %v2388_v17 }
 0x3f1   : > { %1351 = vperm.xlu1 %1989, %v1253_v57   ;;  %v755_v8 = vadd.f32 1.0, %v2009_v58  ;;  %v2011_v1 = vpop.eup %2010 }
 0x3f2   : > { %2014 = vrcp.f32 %v754_v44  ;;  %v757_v36 = vadd.f32 1.0, %v2011_v1 }
 0x3f3   : > { %2016 = vrcp.f32 %v755_v8 }
 0x3f4   : > { %1433 = vperm.xlu0 %1988, %v1255_v37   ;;  %2018 = vrcp.f32 %v757_v36 }
 0x3f5   : > { %1392 = vperm.xlu1 %1989, %v1254_v50  }
 0x3f8   : > { %1509 = vperm.xlu0 %1988, %v1258_v5  }
 0x3f9   : > { %1990 = vset.pattern.permute.xlu1 %v2896_v59 }
 0x3fa   : > { %1406 = vperm.xlu1 %1990, %v1254_v50   ;;  %v2013_v23 = vpop.eup %2012 }
 0x3fc   : > { %1992 = vset.pattern.permute.xlu0 %v2896_v59  ;;  %v2015_v50 = vpop.eup %2014 }
 0x3fd   : > { %1365 = vperm.xlu0 %1992, %v1253_v57   ;;  %v1640_v57 = vld [vmem:[#allocation2] sm:$0x1]  ;;  %v2017_v14 = vpop.eup %2016 }
 0x3fe   : > { %1447 = vperm.xlu1 %1990, %v1255_v37   ;;  %v768_v37 = vmul.f32 %v2013_v23, %v2005_v42  ;;  %v767_v15 = vmul.f32 %v2017_v14, %v2009_v58  ;;  %v2019_v54 = vpop.eup %2018 }
 0x3ff   : > { %v769_v55 = vmul.f32 %v2019_v54, %v2011_v1 }
 0x401   : > { %1425 = vrot.lane.b32.xlu0 %v2540_v63, %s2897_s21  ;;  %v773_v30 = vsel %vm765_vm10, %v2019_v54, %v769_v55 }
 0x402   : > { %1991 = vset.pattern.permute.xlu1 %v2120_v28 }
 0x403   : > { %1474 = vperm.xlu1 %1991, %v1257_v61  }
 0x407   : > { %1423 = vrot.lane.b32.xlu1 %v2538_v16, %s2897_s21 }
 0x408   : > { %1993 = vset.pattern.permute.xlu1 %v2896_v59 }
 0x40b   : > { %1464 = vrot.lane.b32.xlu1 %v2538_v16, %s2898_s26 }
 0x40f   : > { %1466 = vrot.lane.b32.xlu1 %v2540_v63, %s2898_s26 }
 0x456   : > { %v1265_v19 = vpop.permute.xlu1 %1264  ;;  %v1263_v51 = vpop.permute.xlu0 %1262 }
 0x457   : > { %v2613_v10 = vsel %vm841_vm4, %v1263_v51, %v1265_v19  ;;  %v2617_v2 = vsel %vm841_vm4, %v1265_v19, %v1263_v51 }
 0x458   : > { %1306 = vrot.lane.b32.xlu1 %v2617_v2, %s2897_s21  ;;  %1308 = vrot.lane.b32.xlu0 %v2613_v10, %s2897_s21  ;;  %v1347_v44 = vmul.f32 %v2617_v2, %v2401_v24  ;;  %v1348_v58 = vmul.f32 %v2613_v10, %v2404_v25 }
 0x45a   : > { %v1357_v24 = vrot.slane %v1347_v44, %v2390_v18  ;;  %v1361_v25 = vrot.slane %v1348_v58, %v2390_v18 }
 0x45c   : > { %1523 = vperm.xlu1 %1993, %v1258_v5   ;;  %1382 = vrot.lane.b32.xlu0 %v2617_v2, %s2898_s26  ;;  %v772_v5 = vsel %vm764_vm7, %v2013_v23, %v768_v37 }
 0x460   : > { %1994 = vset.pattern.permute.xlu1 %v2120_v28  ;;  %1488 = vperm.xlu0 %1992, %v1257_v61   ;;  %v766_v61 = vmul.f32 %v2015_v50, %v2007_v13  ;;  %v1280_v13 = vrot.slane %v2540_v63, %v2390_v18 }
 0x461   : > { %1544 = vperm.xlu1 %1994, %v1259_v48  }
 0x462   : > { %v770_v26 = vsel %vm762_vm8, %v2015_v50, %v766_v61  ;;  %v1371_v50 = vrot.slane %v1347_v44, %v2388_v17 }
 0x464   : > { %1558 = vperm.xlu0 %1992, %v1259_v48   ;;  %v1276_v48 = vrot.slane %v2538_v16, %v2390_v18 }
 0x465   : > { %1384 = vrot.lane.b32.xlu1 %v2613_v10, %s2898_s26  ;;  %s460_s26 = sand.u32 1, %s2106_s16  }
 0x466   : > { %s1848_s28 = sshll.u32 %s460_s26, 6  ;;  %s2823_s30 = scalar_lea.sflag [#allocation4], %s460_s26 }
 0x467   : > { %v1285_v43 = vpop.permute.xlu1 %1284  ;;  %v1271_v4 = vpop.permute.xlu0 %1270  ;;  %s2796_s27 = scalar_lea.vmem [#allocation3], %s1848_s28  ;;  %s2125_s28 = smov [#allocation3]  }
 0x468   : > { %1623 = vperm.xlu0 %1992, %v1610_v38   ;;  %v1295_v8 = vmul.f32 %v1290_v3, %v1285_v43  ;;  %v1281_v23 = vmul.f32 %v1276_v48, %v1271_v4  ;;  %v1282_v36 = vmul.f32 %v1280_v13, %v1271_v4  ;;  %s1782_s29 = sshll.u32 %s2796_s27, 4  ;;  %s2056_s19 = sshll.u32 %s2125_s28, 4  ;;  %s2815_s29 = int_to_ptr.vmem [resolvable:$true] %s1782_s29  ;;  %s2057_s19 = int_to_ptr.vmem [resolvable:$false] %s2056_s19 }
 0x469   : > { %1579 = vperm.xlu1 %1994, %v1260_v22   ;;  %s2052_s0 = scalar_lea.vmem %s2815_s29, 1024  ;;  %s2058_s13 = scalar_lea.vmem %s2057_s19, 2048 }
 0x46a   : > { %p2053_p11 = scmp.ne.s32.totalorder %s2815_s29, %s2052_s0  ;;  %p2059_p0 = scmp.lt.s32.totalorder %s2815_s29, %s2057_s19 }
 0x46b   : > { %v1317_v39 = vpop.permute.xlu0 %1316  ;;  %p2060_p1 = scmp.lt.s32.totalorder %s2058_s13, %s2052_s0 }
 0x46c   : > { %1997 = vset.pattern.permute.xlu0 %v2120_v28  ;;  %p2054_p12 = pnand %p2053_p11, %p2244_p5 }
 0x46d   : > { %1995 = vset.pattern.permute.xlu1 %v2896_v59  ;;  %1643 = vperm.xlu0 %1997, %v1640_v57   ;;  %v771_v59 = vsel %vm763_vm9, %v2017_v14, %v767_v15  ;;  %p2061_p2 = por %p2060_p1, %p2059_p0 }
 0x46e   : > { %1593 = vperm.xlu1 %1995, %v1260_v22   ;;  %p2055_p13 = pneg %p2054_p12 }
 0x46f   : > { %v1302_v27 = vpop.permute.xlu0 %1301 }
 0x470   : > { %p2062_p3 = pnand %p2061_p2, %p2055_p13 }
 0x471   : > { %1664 = vperm.xlu0 %1997, %v772_v5   ;;  %v1375_v5 = vrot.slane %v1348_v58, %v2388_v17 }
 0x472   : > { %1996 = vset.pattern.permute.xlu1 %v2120_v28  ;;  %v1331_v28 = vpop.permute.xlu1 %1330 }
 0x473   : > { %1613 = vperm.xlu1 %1996, %v1610_v38   ;;  %v2650_v33 = vpop.permute.xlu0 %1433  ;;  %v1296_v38 = vmul.f32 %v1294_v20, %v1285_v43 }
 0x475   : > { %v1298_v54 = vadd.f32 %v1296_v38, %v1282_v36 }
 0x476   : > { %v1352_v34 = vpop.permute.xlu1 %1351 }
 0x477   : > { %1654 = vperm.xlu1 %1996, %v770_v26   ;;  %v2654_v40 = vpop.permute.xlu0 %1509  ;;  %v1305_v20 = vadd.f32 %v1302_v27, %v1298_v54  ;;  %v1362_v13 = vmul.f32 %v1357_v24, %v1352_v34  ;;  %v1363_v48 = vmul.f32 %v1361_v25, %v1352_v34 }
 0x478   : > { %2900 = vst [vmem:[#allocation7_spill] sm:$0xff] %v2654_v40 }
 0x47a   : > { %v2644_v35 = vpop.permute.xlu1 %1392 }
 0x47b   : > { %1659 = vperm.xlu1 %1996, %v771_v59  }
 0x47c   : > { %v1366_v9 = vpop.permute.xlu0 %1365 }
 0x47d   : > { %v1376_v59 = vmul.f32 %v1371_v50, %v1366_v9 }
 0x47e   : > { %v2646_v11 = vpop.permute.xlu1 %1406 }
 0x47f   : > { %1669 = vperm.xlu1 %1996, %v773_v30  }
 0x480   : > { %v1426_v51 = vpop.permute.xlu0 %1425 }
 0x482   : > { %v2648_v29 = vpop.permute.xlu1 %1447 }
 0x486   : > { %v2652_v6 = vpop.permute.xlu1 %1474 }
 0x487   : > { %2899 = vst [vmem:[#allocation6_spill] sm:$0xff] %v2652_v6 }
 0x48a   : > { %v1424_v41 = vpop.permute.xlu1 %1423 }
 0x48e   : > { %v1465_v19 = vpop.permute.xlu1 %1464 }
 0x492   : > { %v1467_v42 = vpop.permute.xlu1 %1466 }
 0x493   : > { %v1469_v24 = vsel %vm979_vm6, %v1467_v42, %v1465_v19 }
 0x4ca   : > { %v1307_v1 = vpop.permute.xlu1 %1306  ;;  %v1309_v22 = vpop.permute.xlu0 %1308 }
 0x4cb   : > { %v1310_v57 = vsel %vm886_vm5, %v1307_v1, %v1309_v22  ;;  %v1311_v63 = vsel %vm886_vm5, %v1309_v22, %v1307_v1  ;;  %v1378_v1 = vadd.f32 %v1376_v59, %v1362_v13 }
 0x4cc   : > { %v1312_v16 = vmul.f32 %v1311_v63, %v2439_v62  ;;  %v1313_v37 = vmul.f32 %v1310_v57, %v2442_v0  ;;  %v1297_v62 = vadd.f32 %v1295_v8, %v1281_v23  ;;  %v1377_v0 = vmul.f32 %v1375_v5, %v1366_v9 }
 0x4cd   : > { %v1427_v9 = vsel %vm886_vm5, %v1424_v41, %v1426_v51 }
 0x4ce   : > { %v1322_v61 = vrot.slane %v1312_v16, %v2390_v18  ;;  %v1326_v14 = vrot.slane %v1313_v37, %v2390_v18  ;;  %v1336_v26 = vrot.slane %v1312_v16, %v2388_v17  ;;  %v1340_v15 = vrot.slane %v1313_v37, %v2388_v17 }
 0x4cf   : > { %v1304_v3 = vadd.f32 %v1302_v27, %v1297_v62  ;;  %v1379_v22 = vadd.f32 %v1377_v0, %v1363_v48  ;;  %v1430_v34 = vmul.f32 %v1427_v9, %v2422_v47  ;;  %v1468_v37 = vsel %vm979_vm6, %v1465_v19, %v1467_v42  ;;  %v2901_v9 = vld [vmem:[#allocation6_spill] sm:$0xff] }
 0x4d0   : > { %v1327_v55 = vmul.f32 %v1322_v61, %v1317_v39  ;;  %v1328_v30 = vmul.f32 %v1326_v14, %v1317_v39  ;;  %v1341_v43 = vmul.f32 %v1336_v26, %v1331_v28  ;;  %v1342_v4 = vmul.f32 %v1340_v15, %v1331_v28  ;;  %v1383_v61 = vpop.permute.xlu0 %1382 }
 0x4d1   : > { %v1428_v28 = vsel %vm886_vm5, %v1426_v51, %v1424_v41  ;;  %v1443_v23 = vrot.slane %v1430_v34, %v2390_v18  ;;  %v1457_v36 = vrot.slane %v1430_v34, %v2388_v17  ;;  %v2708_v47 = vmul.f32 %v2617_v2, %v2432_v53 }
 0x4d2   : > { %v1343_v44 = vadd.f32 %v1341_v43, %v1327_v55  ;;  %v1344_v58 = vadd.f32 %v1342_v4, %v1328_v30  ;;  %v1429_v39 = vmul.f32 %v1428_v28, %v2420_v46  ;;  %v2704_v46 = vmul.f32 %v2613_v10, %v2424_v49 }
 0x4d3   : > { %v1445_v25 = vmul.f32 %v1443_v23, %v2650_v33  ;;  %v1459_v5 = vmul.f32 %v1457_v36, %v2648_v29  ;;  %v1470_v19 = vmul.f32 %v1468_v37, %v2430_v52  ;;  %v1471_v42 = vmul.f32 %v1469_v24, %v2434_v56 }
 0x4d4   : > { %v1345_v40 = vadd.f32 %v1343_v44, %v1304_v3  ;;  %v1346_v16 = vadd.f32 %v1344_v58, %v1305_v20  ;;  %v1439_v8 = vrot.slane %v1429_v39, %v2390_v18  ;;  %v1550_v49 = vrot.slane %v2704_v46, %v2390_v18 }
 0x4d5   : > { %v1554_v53 = vrot.slane %v2708_v47, %v2390_v18  ;;  %v1564_v10 = vrot.slane %v2704_v46, %v2388_v17  ;;  %v1568_v2 = vrot.slane %v2708_v47, %v2388_v17  ;;  %v1506_v14 = vmul.f32 %v1311_v63, %v2448_v21 }
 0x4d6   : > { %v2682_v6 = vadd.f32 %v1378_v1, %v1345_v40  ;;  %v2684_v38 = vadd.f32 %v1379_v22, %v1346_v16  ;;  %v1453_v40 = vrot.slane %v1429_v39, %v2388_v17  ;;  %v1444_v51 = vmul.f32 %v1439_v8, %v2650_v33 }
 0x4d7   : > { %v1461_v15 = vadd.f32 %v1459_v5, %v1445_v25  ;;  %v1480_v0 = vrot.slane %v1470_v19, %v2390_v18  ;;  %v1484_v55 = vrot.slane %v1471_v42, %v2390_v18  ;;  %v1498_v21 = vrot.slane %v1471_v42, %v2388_v17 }
 0x4d8   : > { %v1458_v50 = vmul.f32 %v1453_v40, %v2648_v29  ;;  %v1505_v29 = vmul.f32 %v1310_v57, %v2446_v7  ;;  %v1494_v7 = vrot.slane %v1470_v19, %v2388_v17  ;;  %v1533_v1 = vrot.slane %v1506_v14, %v2388_v17 }
 0x4d9   : > { %v1485_v28 = vmul.f32 %v1480_v0, %v2901_v9  ;;  %v1486_v39 = vmul.f32 %v1484_v55, %v2901_v9 }
 0x4da   : > { %v1460_v26 = vadd.f32 %v1458_v50, %v1444_v51  ;;  %v1529_v58 = vrot.slane %v1505_v29, %v2388_v17 }
 0x4db   : > { %v1524_v27 = vpop.permute.xlu1 %1523 }
 0x4dc   : > { %v1535_v37 = vmul.f32 %v1533_v1, %v1524_v27 }
 0x4df   : > { %v1489_v54 = vpop.permute.xlu0 %1488 }
 0x4e0   : > { %v2700_v41 = vpop.permute.xlu1 %1544  ;;  %v1499_v4 = vmul.f32 %v1494_v7, %v1489_v54  ;;  %v1500_v3 = vmul.f32 %v1498_v21, %v1489_v54 }
 0x4e2   : > { %v1501_v24 = vadd.f32 %v1499_v4, %v1485_v28  ;;  %v1502_v46 = vadd.f32 %v1500_v3, %v1486_v39 }
 0x4e3   : > { %v1559_v34 = vpop.permute.xlu0 %1558 }
 0x4e4   : > { %v1385_v33 = vpop.permute.xlu1 %1384  ;;  %v1569_v51 = vmul.f32 %v1564_v10, %v1559_v34  ;;  %v1570_v25 = vmul.f32 %v1568_v2, %v1559_v34 }
 0x4e5   : > { %v1386_v52 = vsel %vm979_vm6, %v1383_v61, %v1385_v33  ;;  %v1387_v56 = vsel %vm979_vm6, %v1385_v33, %v1383_v61 }
 0x4e6   : > { %v1388_v62 = vmul.f32 %v1386_v52, %v2452_v31  ;;  %v1389_v59 = vmul.f32 %v1387_v56, %v2454_v32  ;;  %v1515_v31 = vrot.slane %v1505_v29, %v2390_v18  ;;  %v1519_v32 = vrot.slane %v1506_v14, %v2390_v18 }
 0x4e7   : > { %v1575_v22 = vmul.f32 %v2519_v45, %v1387_v56  ;;  %v1576_v16 = vmul.f32 %v2524_v12, %v1386_v52  ;;  %v1555_v14 = vmul.f32 %v1550_v49, %v2700_v41 }
 0x4e8   : > { %v1398_v57 = vrot.slane %v1388_v62, %v2390_v18  ;;  %v1402_v60 = vrot.slane %v1389_v59, %v2390_v18  ;;  %v1412_v63 = vrot.slane %v1388_v62, %v2388_v17  ;;  %v1416_v30 = vrot.slane %v1389_v59, %v2388_v17  ;;  %v1580_v43 = vpop.permute.xlu1 %1579  ;;  %v1624_v62 = vpop.permute.xlu0 %1623 }
 0x4e9   : > { %v1585_v50 = vrot.slane %v1575_v22, %v2390_v18  ;;  %v1589_v5 = vrot.slane %v1576_v16, %v2390_v18  ;;  %v1599_v61 = vrot.slane %v1575_v22, %v2388_v17  ;;  %v1603_v19 = vrot.slane %v1576_v16, %v2388_v17 }
 0x4ea   : > { %v1403_v20 = vmul.f32 %v1398_v57, %v2644_v35  ;;  %v1404_v13 = vmul.f32 %v1402_v60, %v2644_v35  ;;  %v1417_v48 = vmul.f32 %v1412_v63, %v2646_v11  ;;  %v1418_v44 = vmul.f32 %v1416_v30, %v2646_v11  ;;  %v2902_v35 = vld [vmem:[#allocation7_spill] sm:$0xff] }
 0x4eb   : > { %v1520_v40 = vmul.f32 %v1515_v31, %v2902_v35  ;;  %v1521_v36 = vmul.f32 %v1519_v32, %v2902_v35  ;;  %v1534_v11 = vmul.f32 %v1529_v58, %v1524_v27  ;;  %v1571_v56 = vadd.f32 %v1569_v51, %v1555_v14 }
 0x4ec   : > { %v1419_v8 = vadd.f32 %v1417_v48, %v1403_v20  ;;  %v1420_v23 = vadd.f32 %v1418_v44, %v1404_v13  ;;  %v1590_v59 = vmul.f32 %v1585_v50, %v1580_v43  ;;  %v1591_v0 = vmul.f32 %v1589_v5, %v1580_v43  ;;  %v1644_v63 = vpop.permute.xlu0 %1643 }
 0x4ed   : > { %v1594_v12 = vpop.permute.xlu1 %1593  ;;  %v1536_v27 = vadd.f32 %v1534_v11, %v1520_v40  ;;  %v1537_v29 = vadd.f32 %v1535_v37, %v1521_v36  ;;  %v1629_v49 = vrot.slane %v1624_v62, %v2390_v18  ;;  %v1649_v4 = vrot.slane %v1644_v63, %v2390_v18 }
 0x4ee   : > { %v1421_v47 = vadd.f32 %v1419_v8, %v2682_v6  ;;  %v1422_v45 = vadd.f32 %v1420_v23, %v2684_v38  ;;  %v1556_v6 = vmul.f32 %v1554_v53, %v2700_v41  ;;  %v1604_v38 = vmul.f32 %v1599_v61, %v1594_v12 }
 0x4ef   : > { %v1605_v52 = vmul.f32 %v1603_v19, %v1594_v12 }
 0x4f0   : > { %v1462_v42 = vadd.f32 %v1460_v26, %v1421_v47  ;;  %v1463_v33 = vadd.f32 %v1461_v15, %v1422_v45  ;;  %v1572_v54 = vadd.f32 %v1570_v25, %v1556_v6  ;;  %v1606_v26 = vadd.f32 %v1604_v38, %v1590_v59  ;;  %v1665_v28 = vpop.permute.xlu0 %1664 }
 0x4f1   : > { %v1607_v15 = vadd.f32 %v1605_v52, %v1591_v0 }
 0x4f2   : > { %v1503_v10 = vadd.f32 %v1501_v24, %v1462_v42  ;;  %v1504_v2 = vadd.f32 %v1502_v46, %v1463_v33  ;;  %v1614_v55 = vpop.permute.xlu1 %1613 }
 0x4f3   : > { %v1619_v53 = vrot.slane %v1614_v55, %v2390_v18 }
 0x4f4   : > { %v1538_v7 = vadd.f32 %v1536_v27, %v1503_v10  ;;  %v1539_v17 = vadd.f32 %v1537_v29, %v1504_v2 }
 0x4f6   : > { %v1573_v21 = vadd.f32 %v1571_v56, %v1538_v7  ;;  %v1574_v57 = vadd.f32 %v1572_v54, %v1539_v17  ;;  %v1655_v32 = vpop.permute.xlu1 %1654 }
 0x4f8   : > { %v1608_v60 = vadd.f32 %v1606_v26, %v1573_v21  ;;  %v1609_v41 = vadd.f32 %v1607_v15, %v1574_v57 }
 0x4fa   : > { %v1630_v30 = vmul.f32 %v1629_v49, %v1608_v60  ;;  %v1631_v31 = vmul.f32 %v1629_v49, %v1609_v41  ;;  %v1620_v43 = vmul.f32 %v1619_v53, %v1608_v60  ;;  %v1621_v3 = vmul.f32 %v1619_v53, %v1609_v41  ;;  %v1660_v22 = vpop.permute.xlu1 %1659 }
 0x4fc   : > { %v1634_v20 = vrot.slane %v1630_v30, 1  ;;  %v1635_v13 = vrot.slane %v1631_v31, 1 }
 0x4fe   : > { %v1638_v48 = vadd.f32 %v1634_v20, %v1620_v43  ;;  %v1639_v44 = vadd.f32 %v1635_v13, %v1621_v3  ;;  %v1670_v37 = vpop.permute.xlu1 %1669 }
 0x500   : > { %v1650_v58 = vadd.f32 %v1649_v4, %v1638_v48  ;;  %v1651_v1 = vadd.f32 %v1649_v4, %v1639_v44 }
 0x502   : > { %v1675_v16 = vrot.slane %v1650_v58, %v2390_v18  ;;  %v1679_v9 = vrot.slane %v1651_v1, %v2390_v18 }
 0x504   : > { %v2767_v39 = vadd.f32 %v1675_v16, %v1665_v28  ;;  %v2769_v34 = vadd.f32 %v1679_v9, %v1665_v28  ;;  %v2771_v8 = vadd.f32 %v1675_v16, %v1655_v32  ;;  %v2773_v23 = vadd.f32 %v1679_v9, %v1655_v32 }
 0x505   : > { %v2775_v35 = vadd.f32 %v1675_v16, %v1660_v22  ;;  %v2777_v40 = vadd.f32 %v1679_v9, %v1660_v22  ;;  %v2783_v46 = vadd.f32 %v1675_v16, %v1670_v37  ;;  %v2785_v47 = vadd.f32 %v1679_v9, %v1670_v37 }
 0x506   : > { %v1692_v36 = vand.u32 2147483647, %v2767_v39  ;;  %v1693_v11 = vand.u32 2147483647, %v2769_v34  ;;  %v1688_v18 = vand.u32 2147483647, %v2771_v8 }
 0x507   : > { %v1689_v24 = vand.u32 2147483647, %v2773_v23  ;;  %v1690_v51 = vand.u32 2147483647, %v2775_v35  ;;  %v1691_v25 = vand.u32 2147483647, %v2777_v40 }
 0x508   : > { %v1700_v45 = vsub.f32 0.0, %v1692_v36  ;;  %v1701_v12 = vsub.f32 0.0, %v1693_v11  ;;  %v1696_v50 = vsub.f32 0.0, %v1688_v18  ;;  %v1694_v14 = vand.u32 2147483647, %v2783_v46 }
 0x509   : > { %v1697_v5 = vsub.f32 0.0, %v1689_v24  ;;  %v1698_v42 = vsub.f32 0.0, %v1690_v51  ;;  %v1699_v33 = vsub.f32 0.0, %v1691_v25  ;;  %v1695_v38 = vand.u32 2147483647, %v2785_v47 }
 0x50a   : > { %v1712_v61 = vmul.f32 1.442695, %v1700_v45  ;;  %v1714_v19 = vmul.f32 1.442695, %v1701_v12  ;;  %v1704_v27 = vmul.f32 1.442695, %v1696_v50 }
 0x50b   : > { %v1706_v29 = vmul.f32 1.442695, %v1697_v5  ;;  %v1708_v6 = vmul.f32 1.442695, %v1698_v42  ;;  %v1710_v52 = vmul.f32 1.442695, %v1699_v33 }
 0x50c   : > { %2020 = vpow2.f32 %v1712_v61  ;;  %v1702_v10 = vsub.f32 0.0, %v1694_v14  ;;  %v1703_v2 = vsub.f32 0.0, %v1695_v38  ;;  %vm1740_vm11 = vcmp.ge.f32.partialorder %v2767_v39, 0.0 }
 0x50d   : > { %2022 = vpow2.f32 %v1714_v19  ;;  %vm1741_vm12 = vcmp.ge.f32.partialorder %v2769_v34, 0.0  ;;  %vm1736_vm13 = vcmp.ge.f32.partialorder %v2771_v8, 0.0  ;;  %vm1737_vm14 = vcmp.ge.f32.partialorder %v2773_v23, 0.0 }
 0x50e   : > { %2024 = vpow2.f32 %v1704_v27  ;;  %v1716_v56 = vmul.f32 1.442695, %v1702_v10  ;;  %v1718_v54 = vmul.f32 1.442695, %v1703_v2  ;;  %vm1738_vm15 = vcmp.ge.f32.partialorder %v2775_v35, 0.0 }
 0x50f   : > { %2026 = vpow2.f32 %v1706_v29  ;;  %vm1739_vm0 = vcmp.ge.f32.partialorder %v2777_v40, 0.0  ;;  %vm1742_vm1 = vcmp.ge.f32.partialorder %v2783_v46, 0.0  ;;  %vm1743_vm2 = vcmp.ge.f32.partialorder %v2785_v47, 0.0 }
 0x510   : > { %2028 = vpow2.f32 %v1708_v6 }
 0x511   : > { %2030 = vpow2.f32 %v1710_v52 }
 0x512   : > { %2032 = vpow2.f32 %v1716_v56 }
 0x513   : > { %2034 = vpow2.f32 %v1718_v54 }
 0x516   : > { %v2021_v62 = vpop.eup %2020 }
 0x517   : > { %v2023_v59 = vpop.eup %2022  ;;  %v1724_v0 = vadd.f32 1.0, %v2021_v62 }
 0x518   : > { %v2025_v55 = vpop.eup %2024  ;;  %v1725_v7 = vadd.f32 1.0, %v2023_v59 }
 0x519   : > { %v2027_v17 = vpop.eup %2026  ;;  %2036 = vrcp.f32 %v1724_v0  ;;  %v1720_v26 = vadd.f32 1.0, %v2025_v55 }
 0x51a   : > { %v2029_v15 = vpop.eup %2028  ;;  %2038 = vrcp.f32 %v1725_v7  ;;  %v1721_v21 = vadd.f32 1.0, %v2027_v17 }
 0x51b   : > { %v2031_v57 = vpop.eup %2030  ;;  %2040 = vrcp.f32 %v1720_v26  ;;  %v1722_v49 = vadd.f32 1.0, %v2029_v15 }
 0x51c   : > { %v2033_v60 = vpop.eup %2032  ;;  %2042 = vrcp.f32 %v1721_v21  ;;  %v1723_v41 = vadd.f32 1.0, %v2031_v57 }
 0x51d   : > { %v2035_v53 = vpop.eup %2034  ;;  %2044 = vrcp.f32 %v1722_v49  ;;  %v1726_v63 = vadd.f32 1.0, %v2033_v60 }
 0x51e   : > { %2046 = vrcp.f32 %v1723_v41  ;;  %v1727_v30 = vadd.f32 1.0, %v2035_v53 }
 0x51f   : > { %2048 = vrcp.f32 %v1726_v63 }
 0x520   : > { %2050 = vrcp.f32 %v1727_v30 }
 0x523   : > { %v2037_v31 = vpop.eup %2036 }
 0x524   : > { %v2039_v32 = vpop.eup %2038  ;;  %v1748_v4 = vmul.f32 %v2037_v31, %v2021_v62 }
 0x525   : > { %v2041_v43 = vpop.eup %2040  ;;  %v1749_v3 = vmul.f32 %v2039_v32, %v2023_v59 }
 0x526   : > { %v2043_v20 = vpop.eup %2042  ;;  %v1756_v13 = vsel %vm1740_vm11, %v2037_v31, %v1748_v4  ;;  %v1744_v48 = vmul.f32 %v2041_v43, %v2025_v55 }
 0x527   : > { %v2045_v44 = vpop.eup %2044  ;;  %v1757_v58 = vsel %vm1741_vm12, %v2039_v32, %v1749_v3  ;;  %1764 = vst [vmem:[%s2796_s27 + $0x20] sm:$0xff] %v1756_v13  ;;  %v1745_v1 = vmul.f32 %v2043_v20, %v2027_v17 }
 0x528   : > { %v2047_v22 = vpop.eup %2046  ;;  %1765 = vst [vmem:[%s2796_s27 + $0x28] sm:$0xff] %v1757_v58  ;;  %v1752_v16 = vsel %vm1736_vm13, %v2041_v43, %v1744_v48  ;;  %v1746_v9 = vmul.f32 %v2045_v44, %v2029_v15 }
 0x529   : > { %v2049_v28 = vpop.eup %2048  ;;  %v1753_v39 = vsel %vm1737_vm14, %v2043_v20, %v1745_v1  ;;  %1760 = vst [vmem:[%s2796_s27] sm:$0xff] %v1752_v16  ;;  %v1747_v34 = vmul.f32 %v2047_v22, %v2031_v57 }
 0x52a   : > { %v2051_v36 = vpop.eup %2050  ;;  %1761 = vst [vmem:[%s2796_s27 + $0x8] sm:$0xff] %v1753_v39  ;;  %v1754_v8 = vsel %vm1738_vm15, %v2045_v44, %v1746_v9  ;;  %v1750_v23 = vmul.f32 %v2049_v28, %v2033_v60 }
 0x52b   : > { %v1755_v11 = vsel %vm1739_vm0, %v2047_v22, %v1747_v34  ;;  %1762 = vst [vmem:[%s2796_s27 + $0x10] sm:$0xff] %v1754_v8  ;;  %v1751_v37 = vmul.f32 %v2051_v36, %v2035_v53 }
 0x52c   : > { %1763 = vst [vmem:[%s2796_s27 + $0x18] sm:$0xff] %v1755_v11  ;;  %v1758_v35 = vsel %vm1742_vm1, %v2049_v28, %v1750_v23 }
 0x52d   : > { %v1759_v40 = vsel %vm1743_vm2, %v2051_v36, %v1751_v37  ;;  %1766 = vst [vmem:[%s2796_s27 + $0x30] sm:$0xff] %v1758_v35 }
 0x52e   : > { %1767 = vst [vmem:[%s2796_s27 + $0x38] sm:$0xff] %v1759_v40 }
 0x52f   : > { %2065 = shalt.err (!%p2062_p3)
}
 0x530   : > { %s2066_s26 = scalar_lea.hbm %s2813_s22, 1024  ;;  %s2070_s28 = scalar_lea.hbm %s2878_s14, 2048 }
 0x531   : > { %p2067_p4 = scmp.ne.s32.totalorder %s2813_s22, %s2066_s26  ;;  %p2071_p9 = scmp.lt.u32.totalorder %s2813_s22, %s2878_s14 }
 0x532   : > { %p2072_p10 = scmp.lt.u32.totalorder %s2070_s28, %s2066_s26  ;;  %p2074_p12 = scmp.lt.u32.totalorder %s2066_s26, %s2813_s22 }
 0x533   : > { %p2068_p7 = pnand %p2067_p4, %p2244_p5 }
 0x534   : > { %p2073_p11 = por %p2072_p10, %p2071_p9 }
 0x535   : > { %p2069_p8 = pneg %p2068_p7 }
 0x536   : > { %p2075_p13 = por %p2074_p12, %p2073_p11 }
 0x538   : > { %p2076_p0 = pnand %p2075_p13, %p2069_p8 }
 0x53a   : > { %2079 = shalt.err (!%p2076_p0)
}
 0x53b   : > { %s2126_s0 = smov 256   ;;  %s2127_s13 = smov 16  }
 0x53c   : > { %1934 = dma.vmem_to_hbm [thread:$0]  (%p2244_p5), %s2815_s29, 1024, %s2813_s22, %s2823_s30, %s2126_s0, %s2126_s0, %s2127_s13  }
 0x53d PF: > { %p1940_p1 = scmp.ge.s32.totalorder %s2114_s18, 2  ;;  %s1797_s1 = sand.u32 1, %s2102_s15  }
 0x53e   : > { %s1798_s26 = scalar_lea.sflag [#allocation4], %s1797_s1 }
 0x53f   : > { %p1937_p2 = pnand %p1940_p1, %p2248_p6 }
 0x541   : > { %2097 = dma.done.wait (!%p1937_p2), %s1798_s26, 1024  }
 0x542   : > { %2099 = vsyncadd (!%p1937_p2), %s1798_s26, 4294966272  ;;  %p26_p3 = scmp.ge.s32.totalorder %s2231_s20, 4   ;;  %s2903_s15 = smov %s2106_s16 }
 0x543   : > { %s2904_s16 = smov %s2110_s17  ;;  %s2905_s17 = smov %s2242_s23 }
 0x544   : > { %s2906_s18 = smov %s2231_s20  ;;  %28 = sbr.rel (!%p26_p3) target bundleno = 6 (0x6), region = 111 }
 0x54b   :  { %1803 = vsyncpa [#allocation4], 1 }
 0x54c   :  { %1805 = vsyncpa [#allocation4 + $0x1], 1 }

</bundles_post_ra>
